<compile_context>
chip_gen: v5e
topology: v5e:2x2
jax: 0.10.0
libtpu: 0.0.40
codegen_flags: <defaults>
</compile_context>

<pallas_src>
import functools

import jax
import jax.numpy as jnp
from jax.experimental import pallas as pl
from jax.experimental.pallas import tpu as pltpu

NEG_INF = -1e9
LN_EPS = 1e-12


def _vmem_limit_bytes():
    # ~96 MiB on v5e/v6e (128 MiB physical), ~48 MiB on v7x (64 MiB physical).
    try:
        cap = pltpu.get_tpu_info().vmem_capacity_bytes
        return int(min(96 * 1024 * 1024, (cap * 3) // 4))
    except Exception:
        return 64 * 1024 * 1024


VMEM_LIMIT = _vmem_limit_bytes()


def _layernorm(x, gamma, beta, eps=LN_EPS):
    mu = jnp.mean(x, axis=-1, keepdims=True)
    var = jnp.mean(jnp.square(x - mu), axis=-1, keepdims=True)
    return (x - mu) * jax.lax.rsqrt(var + eps) * gamma + beta


# ------------------- kernel 1: proj + pos-embedding + LN --------------------

def _embed_kernel(x_ref, w_ref, b_ref, pos_ref, g_ref, bt_ref, o_ref):
    x = x_ref[...].astype(jnp.bfloat16)                        # (tm, Din)
    y = jnp.dot(x, w_ref[...], preferred_element_type=jnp.float32)
    y = y + b_ref[...] + pos_ref[...]
    o_ref[...] = _layernorm(y, g_ref[...], bt_ref[...]).astype(o_ref.dtype)


def embed(x2d, proj_w, proj_b, pos_emb, gamma, beta, *, tm, seq_tiles):
    M, Din = x2d.shape
    D = proj_w.shape[1]
    vec = pl.BlockSpec((1, D), lambda i: (0, 0))
    return pl.pallas_call(
        _embed_kernel,
        out_shape=jax.ShapeDtypeStruct((M, D), jnp.bfloat16),
        grid=(M // tm,),
        in_specs=[
            pl.BlockSpec((tm, Din), lambda i: (i, 0)),
            pl.BlockSpec((Din, D), lambda i: (0, 0)),
            vec,
            # flattened row index -> position block within the sequence
            pl.BlockSpec((tm, D), lambda i: (i % seq_tiles, 0)),
            vec, vec,
        ],
        out_specs=pl.BlockSpec((tm, D), lambda i: (i, 0)),
        compiler_params=pltpu.CompilerParams(
            dimension_semantics=("parallel",), vmem_limit_bytes=VMEM_LIMIT),
    )(x2d, proj_w, proj_b, pos_emb, gamma, beta)


# ------------------------ kernel 2: fused QKV projection --------------------

def _qkv_kernel(h_ref, w_ref, b_ref, q_ref, k_ref, v_ref, *, d):
    y = jnp.dot(h_ref[...], w_ref[...],
                preferred_element_type=jnp.float32) + b_ref[...]
    q_ref[...] = y[:, :d].astype(q_ref.dtype)
    k_ref[...] = y[:, d:2 * d].astype(k_ref.dtype)
    v_ref[...] = y[:, 2 * d:].astype(v_ref.dtype)


def qkv_proj(h2d, wqkv, bqkv, *, tm):
    M, D = h2d.shape
    spec = pl.BlockSpec((tm, D), lambda i: (i, 0))
    sds = jax.ShapeDtypeStruct((M, D), jnp.bfloat16)
    return pl.pallas_call(
        functools.partial(_qkv_kernel, d=D),
        out_shape=(sds, sds, sds),
        grid=(M // tm,),
        in_specs=[spec,
                  pl.BlockSpec((D, 3 * D), lambda i: (0, 0)),
                  pl.BlockSpec((1, 3 * D), lambda i: (0, 0))],
        out_specs=(spec, spec, spec),
        compiler_params=pltpu.CompilerParams(
            dimension_semantics=("parallel",), vmem_limit_bytes=VMEM_LIMIT),
    )(h2d, wqkv, bqkv)


# ----------------- kernel 3: flash-attention (online softmax) ---------------
# Scale is pre-folded into the Q projection. Per-head m/l stats are stored
# broadcast across each head's dh lanes in (tq, D) scratch so every scratch
# update is a single full-width store per kv step, and the epilogue is one
# fused divide + cast. Fully-masked kv tiles are skipped via prefetched flags.

def _flash_attn_kernel(valid_ref, q_ref, k_ref, v_ref, bias_ref, o_ref,
                       m_sc, l_sc, acc_sc, *, num_heads):
    b = pl.program_id(0)
    ki = pl.program_id(2)
    nk = pl.num_programs(2)
    tq = q_ref.shape[1]
    tk = k_ref.shape[1]
    D = q_ref.shape[2]
    dh = D // num_heads

    @pl.when(ki == 0)
    def _():
        m_sc[...] = jnp.full_like(m_sc, -jnp.inf)
        l_sc[...] = jnp.zeros_like(l_sc)
        acc_sc[...] = jnp.zeros_like(acc_sc)

    @pl.when(valid_ref[b, ki] > 0)                            # skip all-padding kv tiles
    def _():
        q = q_ref[0]                                          # (tq, D) bf16
        k = k_ref[0]                                          # (tk, D) bf16
        v = v_ref[0]                                          # (tk, D) bf16
        bias_b = jnp.broadcast_to(bias_ref[0], (tq, tk))      # hoisted: one broadcast / step

        m_all = m_sc[...]                                     # (tq, D) f32
        l_all = l_sc[...]
        acc_all = acc_sc[...]

        m_pieces, l_pieces, acc_pieces = [], [], []
        for h in range(num_heads):                            # static head slices
            sl = slice(h * dh, (h + 1) * dh)
            s = jax.lax.dot_general(
                q[:, sl], k[:, sl], (((1,), (1,)), ((), ())),
                preferred_element_type=jnp.float32) + bias_b  # (tq, tk)
            m_prev = m_all[:, h * dh:h * dh + 1]              # (tq, 1)
            l_prev = l_all[:, h * dh:h * dh + 1]
            m_new = jnp.maximum(m_prev, jnp.max(s, axis=-1, keepdims=True))
            alpha = jnp.exp(m_prev - m_new)
            # NOTE: on v6e/v7x exp((s - m_new).astype(bf16)) uses the faster
            # bf16 EUP path; kept in f32 here for accuracy / v5e portability.
            p = jnp.exp(s - m_new)
            l_new = alpha * l_prev + jnp.sum(p, axis=-1, keepdims=True)
            pv = jax.lax.dot_general(
                p.astype(jnp.bfloat16), v[:, sl], (((1,), (0,)), ((), ())),
                preferred_element_type=jnp.float32)
            acc_pieces.append(alpha * acc_all[:, sl] + pv)
            m_pieces.append(jnp.broadcast_to(m_new, (tq, dh)))
            l_pieces.append(jnp.broadcast_to(l_new, (tq, dh)))

        # one full-width store per scratch per kv step (no masked lane stores)
        m_sc[...] = jnp.concatenate(m_pieces, axis=-1)
        l_sc[...] = jnp.concatenate(l_pieces, axis=-1)
        acc_sc[...] = jnp.concatenate(acc_pieces, axis=-1)

    @pl.when(ki == nk - 1)
    def _():
        # single fused (exact) normalize + cast directly into the output tile
        o_ref[0] = (acc_sc[...] / l_sc[...]).astype(o_ref.dtype)


def flash_attention(q, k, v, bias, valid, num_heads, *, tq, tk):
    B, L, D = q.shape
    return pl.pallas_call(
        functools.partial(_flash_attn_kernel, num_heads=num_heads),
        out_shape=jax.ShapeDtypeStruct((B, L, D), jnp.bfloat16),
        grid_spec=pltpu.PrefetchScalarGridSpec(
            num_scalar_prefetch=1,
            grid=(B, L // tq, L // tk),
            in_specs=[
                pl.BlockSpec((1, tq, D), lambda b, qi, ki, vf: (b, qi, 0)),
                pl.BlockSpec((1, tk, D), lambda b, qi, ki, vf: (b, ki, 0)),
                pl.BlockSpec((1, tk, D), lambda b, qi, ki, vf: (b, ki, 0)),
                pl.BlockSpec((1, 1, tk), lambda b, qi, ki, vf: (b, 0, ki)),
            ],
            out_specs=pl.BlockSpec((1, tq, D), lambda b, qi, ki, vf: (b, qi, 0)),
            scratch_shapes=[pltpu.VMEM((tq, D), jnp.float32),
                            pltpu.VMEM((tq, D), jnp.float32),
                            pltpu.VMEM((tq, D), jnp.float32)]),
        compiler_params=pltpu.CompilerParams(
            dimension_semantics=("parallel", "parallel", "arbitrary"),
            vmem_limit_bytes=VMEM_LIMIT),
    )(valid, q, k, v, bias)


# ----- kernel 4: wo-proj + residual + LN1 + FFN (w1+gelu+w2) + residual + LN2 -----

def _attn_out_ffn_kernel(x_ref, res_ref, wo_ref, bo_ref, g1_ref, bt1_ref,
                         w1_ref, b1_ref, w2_ref, b2_ref, g2_ref, bt2_ref, o_ref):
    y = jnp.dot(x_ref[...], wo_ref[...],
                preferred_element_type=jnp.float32) + bo_ref[...]
    h1 = _layernorm(y + res_ref[...].astype(jnp.float32), g1_ref[...], bt1_ref[...])
    t = jax.nn.gelu(jnp.dot(h1.astype(jnp.bfloat16), w1_ref[...],
                            preferred_element_type=jnp.float32) + b1_ref[...])
    y2 = jnp.dot(t.astype(jnp.bfloat16), w2_ref[...],
                 preferred_element_type=jnp.float32) + b2_ref[...]
    o_ref[...] = _layernorm(y2 + h1, g2_ref[...], bt2_ref[...]).astype(o_ref.dtype)


def attn_out_ffn(x2d, res2d, p, *, tm):
    M, D = x2d.shape
    F = p["w1"].shape[1]
    spec = pl.BlockSpec((tm, D), lambda i: (i, 0))
    vec_d = pl.BlockSpec((1, D), lambda i: (0, 0))
    return pl.pallas_call(
        _attn_out_ffn_kernel,
        out_shape=jax.ShapeDtypeStruct((M, D), jnp.bfloat16),
        grid=(M // tm,),
        in_specs=[spec, spec,
                  pl.BlockSpec((D, D), lambda i: (0, 0)), vec_d, vec_d, vec_d,
                  pl.BlockSpec((D, F), lambda i: (0, 0)),
                  pl.BlockSpec((1, F), lambda i: (0, 0)),
                  pl.BlockSpec((F, D), lambda i: (0, 0)),
                  vec_d, vec_d, vec_d],
        out_specs=spec,
        compiler_params=pltpu.CompilerParams(
            dimension_semantics=("parallel",), vmem_limit_bytes=VMEM_LIMIT),
    )(x2d, res2d, p["wo"], p["bo"], p["ln1_g"], p["ln1_b"],
      p["w1"], p["b1"], p["w2"], p["b2"], p["ln2_g"], p["ln2_b"])


# ------------ kernel 5: pool-score + masked softmax pool + classifier --------

def _pool_classify_kernel(x_ref, bias_ref, pw_ref, pb_ref, cw_ref, cb_ref, o_ref):
    x = x_ref[0]                                              # (L, D) bf16
    scores = jax.lax.dot_general(                             # (1, L) lane-dense scores
        pw_ref[...], x, (((1,), (1,)), ((), ())),
        preferred_element_type=jnp.float32) + pb_ref[...]
    scores = scores + bias_ref[0]                             # masked_fill(mask==0, -1e9)
    m = jnp.max(scores, axis=-1, keepdims=True)
    p = jnp.exp(scores - m)
    w = p / jnp.sum(p, axis=-1, keepdims=True)                # exact softmax
    pooled = jnp.dot(w.astype(jnp.bfloat16), x,               # (1, D) on the MXU
                     preferred_element_type=jnp.float32)
    logits = jnp.dot(pooled.astype(jnp.bfloat16), cw_ref[...],
                     preferred_element_type=jnp.float32) + cb_ref[...]
    o_ref[0] = logits


def pool_classify(seq, bias, pool_w, pool_b, cls_w, cls_b):
    # TODO(synk): for very long L on v7x, tile this kernel over L with a
    # two-pass (streaming) masked softmax; seq is already read as bf16.
    B, L, D = seq.shape
    C = cls_w.shape[1]
    out = pl.pallas_call(
        _pool_classify_kernel,
        out_shape=jax.ShapeDtypeStruct((B, 1, C), jnp.float32),
        grid=(B,),
        in_specs=[pl.BlockSpec((1, L, D), lambda b: (b, 0, 0)),
                  pl.BlockSpec((1, 1, L), lambda b: (b, 0, 0)),
                  pl.BlockSpec((1, D), lambda b: (0, 0)),
                  pl.BlockSpec((1, 1), lambda b: (0, 0)),
                  pl.BlockSpec((D, C), lambda b: (0, 0)),
                  pl.BlockSpec((1, C), lambda b: (0, 0))],
        out_specs=pl.BlockSpec((1, 1, C), lambda b: (b, 0, 0)),
        compiler_params=pltpu.CompilerParams(
            dimension_semantics=("parallel",), vmem_limit_bytes=VMEM_LIMIT),
    )(seq, bias, pool_w, pool_b, cls_w, cls_b)
    return out.reshape(B, C)


# ---------------------------- model wiring (glue) ----------------------------

def init_params(key, input_dim, hidden_dim, num_classes, ffn_dim, max_len, num_heads):
    keys = iter(jax.random.split(key, 24))
    D = hidden_dim
    scale = 1.0 / float(D // num_heads) ** 0.5               # folded into Q proj

    def w(shape, s=0.02, dtype=jnp.float32):
        return (s * jax.random.normal(next(keys), shape, jnp.float32)).astype(dtype)

    wq, wk, wv = w((D, D)) * scale, w((D, D)), w((D, D))
    bq, bk, bv = w((D,)) * scale, w((D,)), w((D,))
    return {
        # matmul weights stored bf16 (MXU-native), biases / LN / pos kept f32
        "proj_w": w((input_dim, D), dtype=jnp.bfloat16), "proj_b": w((1, D)),
        "pos_emb": w((max_len, D)),
        "emb_ln_g": jnp.ones((1, D), jnp.float32),
        "emb_ln_b": jnp.zeros((1, D), jnp.float32),
        "wqkv": jnp.concatenate([wq, wk, wv], axis=1).astype(jnp.bfloat16),
        "bqkv": jnp.concatenate([bq, bk, bv]).reshape(1, 3 * D),
        "wo": w((D, D), dtype=jnp.bfloat16), "bo": w((1, D)),
        "ln1_g": jnp.ones((1, D), jnp.float32),
        "ln1_b": jnp.zeros((1, D), jnp.float32),
        "w1": w((D, ffn_dim), dtype=jnp.bfloat16), "b1": w((1, ffn_dim)),
        "w2": w((ffn_dim, D), dtype=jnp.bfloat16), "b2": w((1, D)),
        "ln2_g": jnp.ones((1, D), jnp.float32),
        "ln2_b": jnp.zeros((1, D), jnp.float32),
        "pool_w": w((1, D), dtype=jnp.bfloat16),              # stored transposed (1, D)
        "pool_b": w((1, 1)),
        "cls_w": w((D, num_classes), dtype=jnp.bfloat16), "cls_b": w((1, num_classes)),
    }


def protein_bigbird_attention_forward(params, x, mask, num_heads):
    B, L, Din = x.shape
    D = params["proj_w"].shape[1]
    M = B * L

    # tile sizes: large tiles to hit the HBM roofline; clamped for small shapes
    tl = min(512, L)            # embed row tile (<= L so pos blocks stay aligned)
    tm = min(512, M)            # row tile for qkv / fused attn-out+FFN
    tq = min(512, L)
    tk = min(1024, L)
    assert L % tl == 0 and M % tm == 0 and L % tq == 0 and L % tk == 0

    # additive key-mask bias, shared by attention and pooling: (B, 1, L)
    bias = jnp.where(mask[:, None, :] == 0, NEG_INF, 0.0).astype(jnp.float32)
    # per-(batch, kv-tile) "any valid key" flags for skipping padded tiles
    nk = L // tk
    valid = (jnp.max(mask.reshape(B, nk, tk), axis=-1) > 0).astype(jnp.int32)

    # x = self.proj(x); stand-in BigBird embedding: + pos + LayerNorm (fused)
    x2d = x.astype(jnp.float32).reshape(M, Din)
    h2d = embed(x2d, params["proj_w"], params["proj_b"], params["pos_emb"],
                params["emb_ln_g"], params["emb_ln_b"],
                tm=tl, seq_tiles=L // tl)                               # (M, D) bf16

    # fused QKV projection (activation read from HBM once, (D, 3D) matmul)
    q, k, v = qkv_proj(h2d, params["wqkv"], params["bqkv"], tm=tm)      # (M, D) bf16 x3
    q = q.reshape(B, L, D)
    k = k.reshape(B, L, D)
    v = v.reshape(B, L, D)

    # flash attention (scale pre-folded into Q, padded kv tiles skipped)
    ctx = flash_attention(q, k, v, bias, valid, num_heads, tq=tq, tk=tk)  # (B,L,D) bf16

    # wo-proj + residual + LN1 + FFN + residual + LN2, one fused kernel
    h2d = attn_out_ffn(ctx.reshape(M, D), h2d, params, tm=tm)           # (M, D) bf16
    seq = h2d.reshape(B, L, D)                                          # last_hidden_state

    # pooled = self.attn_pool(out.last_hidden_state, mask); self.classifier(pooled)
    return pool_classify(seq, bias, params["pool_w"], params["pool_b"],
                         params["cls_w"], params["cls_b"])              # (B, num_classes)


if __name__ == "__main__":
    B, L = 2, 8
    input_dim, hidden_dim, num_classes = 16, 32, 4
    num_heads, ffn_dim, max_len = 4, 128, 64

    key = jax.random.PRNGKey(0)
    pkey, xkey = jax.random.split(key)
    params = init_params(pkey, input_dim, hidden_dim, num_classes, ffn_dim,
                         max_len, num_heads)
    x = jax.random.normal(xkey, (B, L, input_dim), jnp.float32)
    mask = jnp.array([[1] * L, [1] * 6 + [0] * 2], dtype=jnp.int32)

    fwd = jax.jit(functools.partial(protein_bigbird_attention_forward,
                                    num_heads=num_heads))
    logits = fwd(params, x, mask)
    jax.block_until_ready(logits)
    assert logits.shape == (B, num_classes)
    assert bool(jnp.all(jnp.isfinite(logits)))
    print("KERNEL_OK")
</pallas_src>

<mosaic_0001>
module attributes {stable_mosaic.version = 11 : i64} {
  func.func @_embed_kernel(%arg0: i32, %arg1: memref<8x16xf32, #tpu.memory_space<vmem>>, %arg2: memref<16x32xbf16, #tpu.memory_space<vmem>>, %arg3: memref<1x32xf32, #tpu.memory_space<vmem>>, %arg4: memref<8x32xf32, #tpu.memory_space<vmem>>, %arg5: memref<1x32xf32, #tpu.memory_space<vmem>>, %arg6: memref<1x32xf32, #tpu.memory_space<vmem>>, %arg7: memref<8x32xbf16, #tpu.memory_space<vmem>>) attributes {dimension_semantics = [#tpu.dimension_semantics<parallel>], iteration_bounds = array<i64: 2>, scalar_prefetch = 0 : i64, scratch_operands = 0 : i64, tpu.core_type = #tpu.core_type<tc>, window_params = [{transform_indices = @transform_0, window_bounds = array<i64: 8, 16>}, {pipeline_mode = #tpu.pipeline_mode<synchronous>, transform_indices = @transform_1, window_bounds = array<i64: 16, 32>}, {pipeline_mode = #tpu.pipeline_mode<synchronous>, transform_indices = @transform_2, window_bounds = array<i64: 1, 32>}, {transform_indices = @transform_3, window_bounds = array<i64: 8, 32>}, {pipeline_mode = #tpu.pipeline_mode<synchronous>, transform_indices = @transform_4, window_bounds = array<i64: 1, 32>}, {pipeline_mode = #tpu.pipeline_mode<synchronous>, transform_indices = @transform_5, window_bounds = array<i64: 1, 32>}, {transform_indices = @transform_6, window_bounds = array<i64: 8, 32>}]} {
    %c0 = arith.constant 0 : index
    %c0_0 = arith.constant 0 : index
    %0 = vector.load %arg1[%c0, %c0_0] : memref<8x16xf32, #tpu.memory_space<vmem>>, vector<8x16xf32>
    %1 = arith.truncf %0 : vector<8x16xf32> to vector<8x16xbf16>
    %c0_1 = arith.constant 0 : index
    %c0_2 = arith.constant 0 : index
    %2 = vector.load %arg2[%c0_1, %c0_2] : memref<16x32xbf16, #tpu.memory_space<vmem>>, vector<16x32xbf16>
    %cst = arith.constant dense<0.000000e+00> : vector<8x32xf32>
    %3 = tpu.matmul %1, %2, %cst {dimension_numbers = #tpu.dot_dimension_numbers<[1], [0], [0], [1], [0, 0, 1, 1], [], []>} : vector<8x16xbf16>, vector<16x32xbf16>, vector<8x32xf32> -> vector<8x32xf32>
    %c0_3 = arith.constant 0 : index
    %c0_4 = arith.constant 0 : index
    %4 = vector.load %arg3[%c0_3, %c0_4] : memref<1x32xf32, #tpu.memory_space<vmem>>, vector<1x32xf32>
    %5 = vector.broadcast %4 : vector<1x32xf32> to vector<8x32xf32>
    %6 = arith.addf %3, %5 : vector<8x32xf32>
    %c0_5 = arith.constant 0 : index
    %c0_6 = arith.constant 0 : index
    %7 = vector.load %arg4[%c0_5, %c0_6] : memref<8x32xf32, #tpu.memory_space<vmem>>, vector<8x32xf32>
    %8 = arith.addf %6, %7 : vector<8x32xf32>
    %c0_7 = arith.constant 0 : index
    %c0_8 = arith.constant 0 : index
    %9 = vector.load %arg5[%c0_7, %c0_8] : memref<1x32xf32, #tpu.memory_space<vmem>>, vector<1x32xf32>
    %c0_9 = arith.constant 0 : index
    %c0_10 = arith.constant 0 : index
    %10 = vector.load %arg6[%c0_9, %c0_10] : memref<1x32xf32, #tpu.memory_space<vmem>>, vector<1x32xf32>
    %cst_11 = arith.constant dense<0.000000e+00> : vector<8xf32>
    %11 = vector.multi_reduction <add>, %8, %cst_11 [1] : vector<8x32xf32> to vector<8xf32>
    %12 = vector.shape_cast %11 : vector<8xf32> to vector<8x1xf32>
    %cst_12 = arith.constant 3.200000e+01 : f32
    %13 = vector.broadcast %cst_12 : f32 to vector<8x1xf32>
    %14 = arith.divf %12, %13 : vector<8x1xf32>
    %15 = vector.broadcast %14 : vector<8x1xf32> to vector<8x32xf32>
    %16 = arith.subf %8, %15 : vector<8x32xf32>
    %17 = arith.mulf %16, %16 : vector<8x32xf32>
    %cst_13 = arith.constant dense<0.000000e+00> : vector<8xf32>
    %18 = vector.multi_reduction <add>, %17, %cst_13 [1] : vector<8x32xf32> to vector<8xf32>
    %19 = vector.shape_cast %18 : vector<8xf32> to vector<8x1xf32>
    %cst_14 = arith.constant 3.200000e+01 : f32
    %20 = vector.broadcast %cst_14 : f32 to vector<8x1xf32>
    %21 = arith.divf %19, %20 : vector<8x1xf32>
    %22 = vector.broadcast %14 : vector<8x1xf32> to vector<8x32xf32>
    %23 = arith.subf %8, %22 : vector<8x32xf32>
    %cst_15 = arith.constant 9.99999996E-13 : f32
    %24 = vector.broadcast %cst_15 : f32 to vector<8x1xf32>
    %25 = arith.addf %21, %24 : vector<8x1xf32>
    %26 = math.rsqrt %25 : vector<8x1xf32>
    %27 = vector.broadcast %26 : vector<8x1xf32> to vector<8x32xf32>
    %28 = arith.mulf %23, %27 : vector<8x32xf32>
    %29 = vector.broadcast %9 : vector<1x32xf32> to vector<8x32xf32>
    %30 = arith.mulf %28, %29 : vector<8x32xf32>
    %31 = vector.broadcast %10 : vector<1x32xf32> to vector<8x32xf32>
    %32 = arith.addf %30, %31 : vector<8x32xf32>
    %33 = arith.truncf %32 : vector<8x32xf32> to vector<8x32xbf16>
    %c0_16 = arith.constant 0 : index
    %c0_17 = arith.constant 0 : index
    %34 = vector.load %arg7[%c0_16, %c0_17] : memref<8x32xbf16, #tpu.memory_space<vmem>>, vector<8x32xbf16>
    tpu.vector_store %arg7[%c0_16, %c0_17], %33 {strides = array<i32>} : memref<8x32xbf16, #tpu.memory_space<vmem>>, vector<8x32xbf16>,
    return
  }
  func.func @transform_0(%arg0: i32) -> (i32, i32) {
    %c0_i32 = arith.constant 0 : i32
    %c0_i32_0 = arith.constant 0 : i32
    return %arg0, %c0_i32 : i32, i32
  }
  func.func @transform_1(%arg0: i32) -> (i32, i32) {
    %c0_i32 = arith.constant 0 : i32
    %c0_i32_0 = arith.constant 0 : i32
    %c0_i32_1 = arith.constant 0 : i32
    return %c0_i32, %c0_i32_0 : i32, i32
  }
  func.func @transform_2(%arg0: i32) -> (i32, i32) {
    %c0_i32 = arith.constant 0 : i32
    %c0_i32_0 = arith.constant 0 : i32
    %c0_i32_1 = arith.constant 0 : i32
    return %c0_i32, %c0_i32_0 : i32, i32
  }
  func.func @transform_3(%arg0: i32) -> (i32, i32) {
    %c1_i32 = arith.constant 1 : i32
    %c0_i32 = arith.constant 0 : i32
    %0 = arith.cmpi eq, %c1_i32, %c0_i32 : i32
    %c1_i32_0 = arith.constant 1 : i32
    %1 = arith.select %0, %c1_i32_0, %c1_i32 : i32
    %2 = arith.remsi %arg0, %1 : i32
    %c0_i32_1 = arith.constant 0 : i32
    %3 = arith.cmpi ne, %2, %c0_i32_1 : i32
    %c0_i32_2 = arith.constant 0 : i32
    %4 = arith.cmpi slt, %2, %c0_i32_2 : i32
    %c0_i32_3 = arith.constant 0 : i32
    %5 = arith.cmpi slt, %1, %c0_i32_3 : i32
    %6 = arith.xori %4, %5 : i1
    %7 = arith.andi %6, %3 : i1
    %8 = arith.addi %2, %1 : i32
    %9 = arith.select %7, %8, %2 : i32
    %c0_i32_4 = arith.constant 0 : i32
    %c0_i32_5 = arith.constant 0 : i32
    return %9, %c0_i32_4 : i32, i32
  }
  func.func @transform_4(%arg0: i32) -> (i32, i32) {
    %c0_i32 = arith.constant 0 : i32
    %c0_i32_0 = arith.constant 0 : i32
    %c0_i32_1 = arith.constant 0 : i32
    return %c0_i32, %c0_i32_0 : i32, i32
  }
  func.func @transform_5(%arg0: i32) -> (i32, i32) {
    %c0_i32 = arith.constant 0 : i32
    %c0_i32_0 = arith.constant 0 : i32
    %c0_i32_1 = arith.constant 0 : i32
    return %c0_i32, %c0_i32_0 : i32, i32
  }
  func.func @transform_6(%arg0: i32) -> (i32, i32) {
    %c0_i32 = arith.constant 0 : i32
    %c0_i32_0 = arith.constant 0 : i32
    return %arg0, %c0_i32 : i32, i32
  }
}

module attributes {stable_mosaic.version = 11 : i64} {
  func.func @_qkv_kernel(%arg0: i32, %arg1: memref<16x32xbf16, #tpu.memory_space<vmem>>, %arg2: memref<32x96xbf16, #tpu.memory_space<vmem>>, %arg3: memref<1x96xf32, #tpu.memory_space<vmem>>, %arg4: memref<16x32xbf16, #tpu.memory_space<vmem>>, %arg5: memref<16x32xbf16, #tpu.memory_space<vmem>>, %arg6: memref<16x32xbf16, #tpu.memory_space<vmem>>) attributes {dimension_semantics = [#tpu.dimension_semantics<parallel>], iteration_bounds = array<i64: 1>, scalar_prefetch = 0 : i64, scratch_operands = 0 : i64, tpu.core_type = #tpu.core_type<tc>, window_params = [{transform_indices = @transform_0, window_bounds = array<i64: 16, 32>}, {pipeline_mode = #tpu.pipeline_mode<synchronous>, transform_indices = @transform_1, window_bounds = array<i64: 32, 96>}, {pipeline_mode = #tpu.pipeline_mode<synchronous>, transform_indices = @transform_2, window_bounds = array<i64: 1, 96>}, {transform_indices = @transform_3, window_bounds = array<i64: 16, 32>}, {transform_indices = @transform_4, window_bounds = array<i64: 16, 32>}, {transform_indices = @transform_5, window_bounds = array<i64: 16, 32>}]} {
    %c0 = arith.constant 0 : index
    %c0_0 = arith.constant 0 : index
    %0 = vector.load %arg1[%c0, %c0_0] : memref<16x32xbf16, #tpu.memory_space<vmem>>, vector<16x32xbf16>
    %c0_1 = arith.constant 0 : index
    %c0_2 = arith.constant 0 : index
    %1 = vector.load %arg2[%c0_1, %c0_2] : memref<32x96xbf16, #tpu.memory_space<vmem>>, vector<32x96xbf16>
    %cst = arith.constant dense<0.000000e+00> : vector<16x96xf32>
    %2 = tpu.matmul %0, %1, %cst {dimension_numbers = #tpu.dot_dimension_numbers<[1], [0], [0], [1], [0, 0, 1, 1], [], []>} : vector<16x32xbf16>, vector<32x96xbf16>, vector<16x96xf32> -> vector<16x96xf32>
    %c0_3 = arith.constant 0 : index
    %c0_4 = arith.constant 0 : index
    %3 = vector.load %arg3[%c0_3, %c0_4] : memref<1x96xf32, #tpu.memory_space<vmem>>, vector<1x96xf32>
    %4 = vector.broadcast %3 : vector<1x96xf32> to vector<16x96xf32>
    %5 = arith.addf %2, %4 : vector<16x96xf32>
    %6 = vector.extract_strided_slice %5 {offsets = [0, 0], sizes = [16, 32], strides = [1, 1]} : vector<16x96xf32> to vector<16x32xf32>
    %7 = arith.truncf %6 : vector<16x32xf32> to vector<16x32xbf16>
    %c0_5 = arith.constant 0 : index
    %c0_6 = arith.constant 0 : index
    %8 = vector.load %arg4[%c0_5, %c0_6] : memref<16x32xbf16, #tpu.memory_space<vmem>>, vector<16x32xbf16>
    tpu.vector_store %arg4[%c0_5, %c0_6], %7 {strides = array<i32>} : memref<16x32xbf16, #tpu.memory_space<vmem>>, vector<16x32xbf16>,
    %9 = vector.extract_strided_slice %5 {offsets = [0, 32], sizes = [16, 32], strides = [1, 1]} : vector<16x96xf32> to vector<16x32xf32>
    %10 = arith.truncf %9 : vector<16x32xf32> to vector<16x32xbf16>
    %c0_7 = arith.constant 0 : index
    %c0_8 = arith.constant 0 : index
    %11 = vector.load %arg5[%c0_7, %c0_8] : memref<16x32xbf16, #tpu.memory_space<vmem>>, vector<16x32xbf16>
    tpu.vector_store %arg5[%c0_7, %c0_8], %10 {strides = array<i32>} : memref<16x32xbf16, #tpu.memory_space<vmem>>, vector<16x32xbf16>,
    %12 = vector.extract_strided_slice %5 {offsets = [0, 64], sizes = [16, 32], strides = [1, 1]} : vector<16x96xf32> to vector<16x32xf32>
    %13 = arith.truncf %12 : vector<16x32xf32> to vector<16x32xbf16>
    %c0_9 = arith.constant 0 : index
    %c0_10 = arith.constant 0 : index
    %14 = vector.load %arg6[%c0_9, %c0_10] : memref<16x32xbf16, #tpu.memory_space<vmem>>, vector<16x32xbf16>
    tpu.vector_store %arg6[%c0_9, %c0_10], %13 {strides = array<i32>} : memref<16x32xbf16, #tpu.memory_space<vmem>>, vector<16x32xbf16>,
    return
  }
  func.func @transform_0(%arg0: i32) -> (i32, i32) {
    %c0_i32 = arith.constant 0 : i32
    %c0_i32_0 = arith.constant 0 : i32
    return %arg0, %c0_i32 : i32, i32
  }
  func.func @transform_1(%arg0: i32) -> (i32, i32) {
    %c0_i32 = arith.constant 0 : i32
    %c0_i32_0 = arith.constant 0 : i32
    %c0_i32_1 = arith.constant 0 : i32
    return %c0_i32, %c0_i32_0 : i32, i32
  }
  func.func @transform_2(%arg0: i32) -> (i32, i32) {
    %c0_i32 = arith.constant 0 : i32
    %c0_i32_0 = arith.constant 0 : i32
    %c0_i32_1 = arith.constant 0 : i32
    return %c0_i32, %c0_i32_0 : i32, i32
  }
  func.func @transform_3(%arg0: i32) -> (i32, i32) {
    %c0_i32 = arith.constant 0 : i32
    %c0_i32_0 = arith.constant 0 : i32
    return %arg0, %c0_i32 : i32, i32
  }
  func.func @transform_4(%arg0: i32) -> (i32, i32) {
    %c0_i32 = arith.constant 0 : i32
    %c0_i32_0 = arith.constant 0 : i32
    return %arg0, %c0_i32 : i32, i32
  }
  func.func @transform_5(%arg0: i32) -> (i32, i32) {
    %c0_i32 = arith.constant 0 : i32
    %c0_i32_0 = arith.constant 0 : i32
    return %arg0, %c0_i32 : i32, i32
  }
}

module attributes {stable_mosaic.version = 11 : i64} {
  func.func @_flash_attn_kernel(%arg0: i32, %arg1: i32, %arg2: i32, %arg3: memref<2x1xi32, #tpu.memory_space<smem>>, %arg4: memref<1x8x32xbf16, #tpu.memory_space<vmem>>, %arg5: memref<1x8x32xbf16, #tpu.memory_space<vmem>>, %arg6: memref<1x8x32xbf16, #tpu.memory_space<vmem>>, %arg7: memref<1x1x8xf32, #tpu.memory_space<vmem>>, %arg8: memref<1x8x32xbf16, #tpu.memory_space<vmem>>, %arg9: memref<8x32xf32, #tpu.memory_space<vmem>>, %arg10: memref<8x32xf32, #tpu.memory_space<vmem>>, %arg11: memref<8x32xf32, #tpu.memory_space<vmem>>) attributes {dimension_semantics = [#tpu.dimension_semantics<parallel>, #tpu.dimension_semantics<parallel>, #tpu.dimension_semantics<arbitrary>], iteration_bounds = array<i64: 2, 1, 1>, scalar_prefetch = 1 : i64, scratch_operands = 3 : i64, tpu.core_type = #tpu.core_type<tc>, window_params = [{transform_indices = @transform_0, window_bounds = array<i64: 1, 8, 32>}, {transform_indices = @transform_1, window_bounds = array<i64: 1, 8, 32>}, {transform_indices = @transform_2, window_bounds = array<i64: 1, 8, 32>}, {transform_indices = @transform_3, window_bounds = array<i64: 1, 1, 8>}, {transform_indices = @transform_4, window_bounds = array<i64: 1, 8, 32>}]} {
    %c0_i32 = arith.constant 0 : i32
    %0 = arith.cmpi eq, %arg2, %c0_i32 : i32
    %1 = arith.extui %0 : i1 to i32
    %c0_i32_0 = arith.constant 0 : i32
    %2 = arith.cmpi ne, %1, %c0_i32_0 : i32
    scf.if %2 {
      %cst = arith.constant 0xFF800000 : f32
      %12 = vector.broadcast %cst : f32 to vector<8x32xf32>
      %c0 = arith.constant 0 : index
      %c0_5 = arith.constant 0 : index
      %13 = vector.load %arg9[%c0, %c0_5] : memref<8x32xf32, #tpu.memory_space<vmem>>, vector<8x32xf32>
      tpu.vector_store %arg9[%c0, %c0_5], %12 {strides = array<i32>} : memref<8x32xf32, #tpu.memory_space<vmem>>, vector<8x32xf32>,
      %cst_6 = arith.constant 0.000000e+00 : f32
      %14 = vector.broadcast %cst_6 : f32 to vector<8x32xf32>
      %c0_7 = arith.constant 0 : index
      %c0_8 = arith.constant 0 : index
      %15 = vector.load %arg10[%c0_7, %c0_8] : memref<8x32xf32, #tpu.memory_space<vmem>>, vector<8x32xf32>
      tpu.vector_store %arg10[%c0_7, %c0_8], %14 {strides = array<i32>} : memref<8x32xf32, #tpu.memory_space<vmem>>, vector<8x32xf32>,
      %cst_9 = arith.constant 0.000000e+00 : f32
      %16 = vector.broadcast %cst_9 : f32 to vector<8x32xf32>
      %c0_10 = arith.constant 0 : index
      %c0_11 = arith.constant 0 : index
      %17 = vector.load %arg11[%c0_10, %c0_11] : memref<8x32xf32, #tpu.memory_space<vmem>>, vector<8x32xf32>
      tpu.vector_store %arg11[%c0_10, %c0_11], %16 {strides = array<i32>} : memref<8x32xf32, #tpu.memory_space<vmem>>, vector<8x32xf32>,
    } else {
    }
    %3 = arith.index_cast %arg0 : i32 to index
    %4 = arith.index_cast %arg2 : i32 to index
    %5 = memref.load %arg3[%3, %4] : memref<2x1xi32, #tpu.memory_space<smem>>
    %c0_i32_1 = arith.constant 0 : i32
    %6 = arith.cmpi sgt, %5, %c0_i32_1 : i32
    %7 = arith.extui %6 : i1 to i32
    %c0_i32_2 = arith.constant 0 : i32
    %8 = arith.cmpi ne, %7, %c0_i32_2 : i32
    scf.if %8 {
      %c0 = arith.constant 0 : index
      %c0_5 = arith.constant 0 : index
      %c0_6 = arith.constant 0 : index
      %12 = vector.load %arg4[%c0, %c0_5, %c0_6] : memref<1x8x32xbf16, #tpu.memory_space<vmem>>, vector<1x8x32xbf16>
      %13 = vector.shape_cast %12 : vector<1x8x32xbf16> to vector<8x32xbf16>
      %c0_7 = arith.constant 0 : index
      %c0_8 = arith.constant 0 : index
      %c0_9 = arith.constant 0 : index
      %14 = vector.load %arg5[%c0_7, %c0_8, %c0_9] : memref<1x8x32xbf16, #tpu.memory_space<vmem>>, vector<1x8x32xbf16>
      %15 = vector.shape_cast %14 : vector<1x8x32xbf16> to vector<8x32xbf16>
      %c0_10 = arith.constant 0 : index
      %c0_11 = arith.constant 0 : index
      %c0_12 = arith.constant 0 : index
      %16 = vector.load %arg6[%c0_10, %c0_11, %c0_12] : memref<1x8x32xbf16, #tpu.memory_space<vmem>>, vector<1x8x32xbf16>
      %17 = vector.shape_cast %16 : vector<1x8x32xbf16> to vector<8x32xbf16>
      %c0_13 = arith.constant 0 : index
      %c0_14 = arith.constant 0 : index
      %c0_15 = arith.constant 0 : index
      %18 = vector.load %arg7[%c0_13, %c0_14, %c0_15] : memref<1x1x8xf32, #tpu.memory_space<vmem>>, vector<1x1x8xf32>
      %19 = vector.shape_cast %18 : vector<1x1x8xf32> to vector<1x8xf32>
      %20 = vector.shape_cast %19 : vector<1x8xf32> to vector<1x8xf32>
      %21 = vector.broadcast %20 : vector<1x8xf32> to vector<8x8xf32>
      %c0_16 = arith.constant 0 : index
      %c0_17 = arith.constant 0 : index
      %22 = vector.load %arg9[%c0_16, %c0_17] : memref<8x32xf32, #tpu.memory_space<vmem>>, vector<8x32xf32>
      %c0_18 = arith.constant 0 : index
      %c0_19 = arith.constant 0 : index
      %23 = vector.load %arg10[%c0_18, %c0_19] : memref<8x32xf32, #tpu.memory_space<vmem>>, vector<8x32xf32>
      %c0_20 = arith.constant 0 : index
      %c0_21 = arith.constant 0 : index
      %24 = vector.load %arg11[%c0_20, %c0_21] : memref<8x32xf32, #tpu.memory_space<vmem>>, vector<8x32xf32>
      %25 = vector.extract_strided_slice %13 {offsets = [0, 0], sizes = [8, 8], strides = [1, 1]} : vector<8x32xbf16> to vector<8x8xbf16>
      %26 = vector.extract_strided_slice %15 {offsets = [0, 0], sizes = [8, 8], strides = [1, 1]} : vector<8x32xbf16> to vector<8x8xbf16>
      %cst = arith.constant dense<0.000000e+00> : vector<8x8xf32>
      %27 = tpu.matmul %25, %26, %cst {dimension_numbers = #tpu.dot_dimension_numbers<[1], [1], [0], [0], [0, 0, 1, 0], [], []>} : vector<8x8xbf16>, vector<8x8xbf16>, vector<8x8xf32> -> vector<8x8xf32>
      %28 = arith.addf %27, %21 : vector<8x8xf32>
      %29 = vector.extract_strided_slice %22 {offsets = [0, 0], sizes = [8, 1], strides = [1, 1]} : vector<8x32xf32> to vector<8x1xf32>
      %30 = vector.extract_strided_slice %23 {offsets = [0, 0], sizes = [8, 1], strides = [1, 1]} : vector<8x32xf32> to vector<8x1xf32>
      %cst_22 = arith.constant dense<0xFF800000> : vector<8xf32>
      %31 = vector.multi_reduction <maximumf>, %28, %cst_22 [1] : vector<8x8xf32> to vector<8xf32>
      %32 = vector.shape_cast %31 : vector<8xf32> to vector<8x1xf32>
      %33 = arith.maximumf %29, %32 : vector<8x1xf32>
      %34 = arith.subf %29, %33 : vector<8x1xf32>
      %35 = math.exp %34 : vector<8x1xf32>
      %36 = vector.broadcast %33 : vector<8x1xf32> to vector<8x8xf32>
      %37 = arith.subf %28, %36 : vector<8x8xf32>
      %38 = math.exp %37 : vector<8x8xf32>
      %39 = arith.mulf %35, %30 : vector<8x1xf32>
      %cst_23 = arith.constant dense<0.000000e+00> : vector<8xf32>
      %40 = vector.multi_reduction <add>, %38, %cst_23 [1] : vector<8x8xf32> to vector<8xf32>
      %41 = vector.shape_cast %40 : vector<8xf32> to vector<8x1xf32>
      %42 = arith.addf %39, %41 : vector<8x1xf32>
      %43 = arith.truncf %38 : vector<8x8xf32> to vector<8x8xbf16>
      %44 = vector.extract_strided_slice %17 {offsets = [0, 0], sizes = [8, 8], strides = [1, 1]} : vector<8x32xbf16> to vector<8x8xbf16>
      %cst_24 = arith.constant dense<0.000000e+00> : vector<8x8xf32>
      %45 = tpu.matmul %43, %44, %cst_24 {dimension_numbers = #tpu.dot_dimension_numbers<[1], [0], [0], [1], [0, 0, 1, 1], [], []>} : vector<8x8xbf16>, vector<8x8xbf16>, vector<8x8xf32> -> vector<8x8xf32>
      %46 = vector.extract_strided_slice %24 {offsets = [0, 0], sizes = [8, 8], strides = [1, 1]} : vector<8x32xf32> to vector<8x8xf32>
      %47 = vector.broadcast %35 : vector<8x1xf32> to vector<8x8xf32>
      %48 = arith.mulf %47, %46 : vector<8x8xf32>
      %49 = arith.addf %48, %45 : vector<8x8xf32>
      %50 = vector.shape_cast %33 : vector<8x1xf32> to vector<8x1xf32>
      %51 = vector.broadcast %50 : vector<8x1xf32> to vector<8x8xf32>
      %52 = vector.shape_cast %42 : vector<8x1xf32> to vector<8x1xf32>
      %53 = vector.broadcast %52 : vector<8x1xf32> to vector<8x8xf32>
      %54 = vector.extract_strided_slice %13 {offsets = [0, 8], sizes = [8, 8], strides = [1, 1]} : vector<8x32xbf16> to vector<8x8xbf16>
      %55 = vector.extract_strided_slice %15 {offsets = [0, 8], sizes = [8, 8], strides = [1, 1]} : vector<8x32xbf16> to vector<8x8xbf16>
      %cst_25 = arith.constant dense<0.000000e+00> : vector<8x8xf32>
      %56 = tpu.matmul %54, %55, %cst_25 {dimension_numbers = #tpu.dot_dimension_numbers<[1], [1], [0], [0], [0, 0, 1, 0], [], []>} : vector<8x8xbf16>, vector<8x8xbf16>, vector<8x8xf32> -> vector<8x8xf32>
      %57 = arith.addf %56, %21 : vector<8x8xf32>
      %58 = vector.extract_strided_slice %22 {offsets = [0, 8], sizes = [8, 1], strides = [1, 1]} : vector<8x32xf32> to vector<8x1xf32>
      %59 = vector.extract_strided_slice %23 {offsets = [0, 8], sizes = [8, 1], strides = [1, 1]} : vector<8x32xf32> to vector<8x1xf32>
      %cst_26 = arith.constant dense<0xFF800000> : vector<8xf32>
      %60 = vector.multi_reduction <maximumf>, %57, %cst_26 [1] : vector<8x8xf32> to vector<8xf32>
      %61 = vector.shape_cast %60 : vector<8xf32> to vector<8x1xf32>
      %62 = arith.maximumf %58, %61 : vector<8x1xf32>
      %63 = arith.subf %58, %62 : vector<8x1xf32>
      %64 = math.exp %63 : vector<8x1xf32>
      %65 = vector.broadcast %62 : vector<8x1xf32> to vector<8x8xf32>
      %66 = arith.subf %57, %65 : vector<8x8xf32>
      %67 = math.exp %66 : vector<8x8xf32>
      %68 = arith.mulf %64, %59 : vector<8x1xf32>
      %cst_27 = arith.constant dense<0.000000e+00> : vector<8xf32>
      %69 = vector.multi_reduction <add>, %67, %cst_27 [1] : vector<8x8xf32> to vector<8xf32>
      %70 = vector.shape_cast %69 : vector<8xf32> to vector<8x1xf32>
      %71 = arith.addf %68, %70 : vector<8x1xf32>
      %72 = arith.truncf %67 : vector<8x8xf32> to vector<8x8xbf16>
      %73 = vector.extract_strided_slice %17 {offsets = [0, 8], sizes = [8, 8], strides = [1, 1]} : vector<8x32xbf16> to vector<8x8xbf16>
      %cst_28 = arith.constant dense<0.000000e+00> : vector<8x8xf32>
      %74 = tpu.matmul %72, %73, %cst_28 {dimension_numbers = #tpu.dot_dimension_numbers<[1], [0], [0], [1], [0, 0, 1, 1], [], []>} : vector<8x8xbf16>, vector<8x8xbf16>, vector<8x8xf32> -> vector<8x8xf32>
      %75 = vector.extract_strided_slice %24 {offsets = [0, 8], sizes = [8, 8], strides = [1, 1]} : vector<8x32xf32> to vector<8x8xf32>
      %76 = vector.broadcast %64 : vector<8x1xf32> to vector<8x8xf32>
      %77 = arith.mulf %76, %75 : vector<8x8xf32>
      %78 = arith.addf %77, %74 : vector<8x8xf32>
      %79 = vector.shape_cast %62 : vector<8x1xf32> to vector<8x1xf32>
      %80 = vector.broadcast %79 : vector<8x1xf32> to vector<8x8xf32>
      %81 = vector.shape_cast %71 : vector<8x1xf32> to vector<8x1xf32>
      %82 = vector.broadcast %81 : vector<8x1xf32> to vector<8x8xf32>
      %83 = vector.extract_strided_slice %13 {offsets = [0, 16], sizes = [8, 8], strides = [1, 1]} : vector<8x32xbf16> to vector<8x8xbf16>
      %84 = vector.extract_strided_slice %15 {offsets = [0, 16], sizes = [8, 8], strides = [1, 1]} : vector<8x32xbf16> to vector<8x8xbf16>
      %cst_29 = arith.constant dense<0.000000e+00> : vector<8x8xf32>
      %85 = tpu.matmul %83, %84, %cst_29 {dimension_numbers = #tpu.dot_dimension_numbers<[1], [1], [0], [0], [0, 0, 1, 0], [], []>} : vector<8x8xbf16>, vector<8x8xbf16>, vector<8x8xf32> -> vector<8x8xf32>
      %86 = arith.addf %85, %21 : vector<8x8xf32>
      %87 = vector.extract_strided_slice %22 {offsets = [0, 16], sizes = [8, 1], strides = [1, 1]} : vector<8x32xf32> to vector<8x1xf32>
      %88 = vector.extract_strided_slice %23 {offsets = [0, 16], sizes = [8, 1], strides = [1, 1]} : vector<8x32xf32> to vector<8x1xf32>
      %cst_30 = arith.constant dense<0xFF800000> : vector<8xf32>
      %89 = vector.multi_reduction <maximumf>, %86, %cst_30 [1] : vector<8x8xf32> to vector<8xf32>
      %90 = vector.shape_cast %89 : vector<8xf32> to vector<8x1xf32>
      %91 = arith.maximumf %87, %90 : vector<8x1xf32>
      %92 = arith.subf %87, %91 : vector<8x1xf32>
      %93 = math.exp %92 : vector<8x1xf32>
      %94 = vector.broadcast %91 : vector<8x1xf32> to vector<8x8xf32>
      %95 = arith.subf %86, %94 : vector<8x8xf32>
      %96 = math.exp %95 : vector<8x8xf32>
      %97 = arith.mulf %93, %88 : vector<8x1xf32>
      %cst_31 = arith.constant dense<0.000000e+00> : vector<8xf32>
      %98 = vector.multi_reduction <add>, %96, %cst_31 [1] : vector<8x8xf32> to vector<8xf32>
      %99 = vector.shape_cast %98 : vector<8xf32> to vector<8x1xf32>
      %100 = arith.addf %97, %99 : vector<8x1xf32>
      %101 = arith.truncf %96 : vector<8x8xf32> to vector<8x8xbf16>
      %102 = vector.extract_strided_slice %17 {offsets = [0, 16], sizes = [8, 8], strides = [1, 1]} : vector<8x32xbf16> to vector<8x8xbf16>
      %cst_32 = arith.constant dense<0.000000e+00> : vector<8x8xf32>
      %103 = tpu.matmul %101, %102, %cst_32 {dimension_numbers = #tpu.dot_dimension_numbers<[1], [0], [0], [1], [0, 0, 1, 1], [], []>} : vector<8x8xbf16>, vector<8x8xbf16>, vector<8x8xf32> -> vector<8x8xf32>
      %104 = vector.extract_strided_slice %24 {offsets = [0, 16], sizes = [8, 8], strides = [1, 1]} : vector<8x32xf32> to vector<8x8xf32>
      %105 = vector.broadcast %93 : vector<8x1xf32> to vector<8x8xf32>
      %106 = arith.mulf %105, %104 : vector<8x8xf32>
      %107 = arith.addf %106, %103 : vector<8x8xf32>
      %108 = vector.shape_cast %91 : vector<8x1xf32> to vector<8x1xf32>
      %109 = vector.broadcast %108 : vector<8x1xf32> to vector<8x8xf32>
      %110 = vector.shape_cast %100 : vector<8x1xf32> to vector<8x1xf32>
      %111 = vector.broadcast %110 : vector<8x1xf32> to vector<8x8xf32>
      %112 = vector.extract_strided_slice %13 {offsets = [0, 24], sizes = [8, 8], strides = [1, 1]} : vector<8x32xbf16> to vector<8x8xbf16>
      %113 = vector.extract_strided_slice %15 {offsets = [0, 24], sizes = [8, 8], strides = [1, 1]} : vector<8x32xbf16> to vector<8x8xbf16>
      %cst_33 = arith.constant dense<0.000000e+00> : vector<8x8xf32>
      %114 = tpu.matmul %112, %113, %cst_33 {dimension_numbers = #tpu.dot_dimension_numbers<[1], [1], [0], [0], [0, 0, 1, 0], [], []>} : vector<8x8xbf16>, vector<8x8xbf16>, vector<8x8xf32> -> vector<8x8xf32>
      %115 = arith.addf %114, %21 : vector<8x8xf32>
      %116 = vector.extract_strided_slice %22 {offsets = [0, 24], sizes = [8, 1], strides = [1, 1]} : vector<8x32xf32> to vector<8x1xf32>
      %117 = vector.extract_strided_slice %23 {offsets = [0, 24], sizes = [8, 1], strides = [1, 1]} : vector<8x32xf32> to vector<8x1xf32>
      %cst_34 = arith.constant dense<0xFF800000> : vector<8xf32>
      %118 = vector.multi_reduction <maximumf>, %115, %cst_34 [1] : vector<8x8xf32> to vector<8xf32>
      %119 = vector.shape_cast %118 : vector<8xf32> to vector<8x1xf32>
      %120 = arith.maximumf %116, %119 : vector<8x1xf32>
      %121 = arith.subf %116, %120 : vector<8x1xf32>
      %122 = math.exp %121 : vector<8x1xf32>
      %123 = vector.broadcast %120 : vector<8x1xf32> to vector<8x8xf32>
      %124 = arith.subf %115, %123 : vector<8x8xf32>
      %125 = math.exp %124 : vector<8x8xf32>
      %126 = arith.mulf %122, %117 : vector<8x1xf32>
      %cst_35 = arith.constant dense<0.000000e+00> : vector<8xf32>
      %127 = vector.multi_reduction <add>, %125, %cst_35 [1] : vector<8x8xf32> to vector<8xf32>
      %128 = vector.shape_cast %127 : vector<8xf32> to vector<8x1xf32>
      %129 = arith.addf %126, %128 : vector<8x1xf32>
      %130 = arith.truncf %125 : vector<8x8xf32> to vector<8x8xbf16>
      %131 = vector.extract_strided_slice %17 {offsets = [0, 24], sizes = [8, 8], strides = [1, 1]} : vector<8x32xbf16> to vector<8x8xbf16>
      %cst_36 = arith.constant dense<0.000000e+00> : vector<8x8xf32>
      %132 = tpu.matmul %130, %131, %cst_36 {dimension_numbers = #tpu.dot_dimension_numbers<[1], [0], [0], [1], [0, 0, 1, 1], [], []>} : vector<8x8xbf16>, vector<8x8xbf16>, vector<8x8xf32> -> vector<8x8xf32>
      %133 = vector.extract_strided_slice %24 {offsets = [0, 24], sizes = [8, 8], strides = [1, 1]} : vector<8x32xf32> to vector<8x8xf32>
      %134 = vector.broadcast %122 : vector<8x1xf32> to vector<8x8xf32>
      %135 = arith.mulf %134, %133 : vector<8x8xf32>
      %136 = arith.addf %135, %132 : vector<8x8xf32>
      %137 = vector.shape_cast %120 : vector<8x1xf32> to vector<8x1xf32>
      %138 = vector.broadcast %137 : vector<8x1xf32> to vector<8x8xf32>
      %139 = vector.shape_cast %129 : vector<8x1xf32> to vector<8x1xf32>
      %140 = vector.broadcast %139 : vector<8x1xf32> to vector<8x8xf32>
      %141 = tpu.concatenate %51, %80, %109, %138 in 1 : vector<8x8xf32>, vector<8x8xf32>, vector<8x8xf32>, vector<8x8xf32> -> vector<8x32xf32>
      %c0_37 = arith.constant 0 : index
      %c0_38 = arith.constant 0 : index
      %142 = vector.load %arg9[%c0_37, %c0_38] : memref<8x32xf32, #tpu.memory_space<vmem>>, vector<8x32xf32>
      tpu.vector_store %arg9[%c0_37, %c0_38], %141 {strides = array<i32>} : memref<8x32xf32, #tpu.memory_space<vmem>>, vector<8x32xf32>,
      %143 = tpu.concatenate %53, %82, %111, %140 in 1 : vector<8x8xf32>, vector<8x8xf32>, vector<8x8xf32>, vector<8x8xf32> -> vector<8x32xf32>
      %c0_39 = arith.constant 0 : index
      %c0_40 = arith.constant 0 : index
      %144 = vector.load %arg10[%c0_39, %c0_40] : memref<8x32xf32, #tpu.memory_space<vmem>>, vector<8x32xf32>
      tpu.vector_store %arg10[%c0_39, %c0_40], %143 {strides = array<i32>} : memref<8x32xf32, #tpu.memory_space<vmem>>, vector<8x32xf32>,
      %145 = tpu.concatenate %49, %78, %107, %136 in 1 : vector<8x8xf32>, vector<8x8xf32>, vector<8x8xf32>, vector<8x8xf32> -> vector<8x32xf32>
      %c0_41 = arith.constant 0 : index
      %c0_42 = arith.constant 0 : index
      %146 = vector.load %arg11[%c0_41, %c0_42] : memref<8x32xf32, #tpu.memory_space<vmem>>, vector<8x32xf32>
      tpu.vector_store %arg11[%c0_41, %c0_42], %145 {strides = array<i32>} : memref<8x32xf32, #tpu.memory_space<vmem>>, vector<8x32xf32>,
    } else {
    }
    %c0_i32_3 = arith.constant 0 : i32
    %9 = arith.cmpi eq, %arg2, %c0_i32_3 : i32
    %10 = arith.extui %9 : i1 to i32
    %c0_i32_4 = arith.constant 0 : i32
    %11 = arith.cmpi ne, %10, %c0_i32_4 : i32
    scf.if %11 {
      %c0 = arith.constant 0 : index
      %c0_5 = arith.constant 0 : index
      %12 = vector.load %arg11[%c0, %c0_5] : memref<8x32xf32, #tpu.memory_space<vmem>>, vector<8x32xf32>
      %c0_6 = arith.constant 0 : index
      %c0_7 = arith.constant 0 : index
      %13 = vector.load %arg10[%c0_6, %c0_7] : memref<8x32xf32, #tpu.memory_space<vmem>>, vector<8x32xf32>
      %14 = arith.divf %12, %13 : vector<8x32xf32>
      %15 = arith.truncf %14 : vector<8x32xf32> to vector<8x32xbf16>
      %c0_8 = arith.constant 0 : index
      %c0_9 = arith.constant 0 : index
      %c0_10 = arith.constant 0 : index
      %16 = vector.load %arg8[%c0_8, %c0_9, %c0_10] : memref<1x8x32xbf16, #tpu.memory_space<vmem>>, vector<1x8x32xbf16>
      %17 = vector.shape_cast %16 : vector<1x8x32xbf16> to vector<8x32xbf16>
      %18 = vector.shape_cast %15 : vector<8x32xbf16> to vector<1x8x32xbf16>
      tpu.vector_store %arg8[%c0_8, %c0_9, %c0_10], %18 {strides = array<i32>} : memref<1x8x32xbf16, #tpu.memory_space<vmem>>, vector<1x8x32xbf16>,
    } else {
    }
    return
  }
  func.func @transform_0(%arg0: i32, %arg1: i32, %arg2: i32, %arg3: memref<2x1xi32, #tpu.memory_space<smem>>) -> (i32, i32, i32) {
    %c0_i32 = arith.constant 0 : i32
    %c0_i32_0 = arith.constant 0 : i32
    return %arg0, %arg1, %c0_i32 : i32, i32, i32
  }
  func.func @transform_1(%arg0: i32, %arg1: i32, %arg2: i32, %arg3: memref<2x1xi32, #tpu.memory_space<smem>>) -> (i32, i32, i32) {
    %c0_i32 = arith.constant 0 : i32
    %c0_i32_0 = arith.constant 0 : i32
    return %arg0, %arg2, %c0_i32 : i32, i32, i32
  }
  func.func @transform_2(%arg0: i32, %arg1: i32, %arg2: i32, %arg3: memref<2x1xi32, #tpu.memory_space<smem>>) -> (i32, i32, i32) {
    %c0_i32 = arith.constant 0 : i32
    %c0_i32_0 = arith.constant 0 : i32
    return %arg0, %arg2, %c0_i32 : i32, i32, i32
  }
  func.func @transform_3(%arg0: i32, %arg1: i32, %arg2: i32, %arg3: memref<2x1xi32, #tpu.memory_space<smem>>) -> (i32, i32, i32) {
    %c0_i32 = arith.constant 0 : i32
    %c0_i32_0 = arith.constant 0 : i32
    return %arg0, %c0_i32, %arg2 : i32, i32, i32
  }
  func.func @transform_4(%arg0: i32, %arg1: i32, %arg2: i32, %arg3: memref<2x1xi32, #tpu.memory_space<smem>>) -> (i32, i32, i32) {
    %c0_i32 = arith.constant 0 : i32
    %c0_i32_0 = arith.constant 0 : i32
    return %arg0, %arg1, %c0_i32 : i32, i32, i32
  }
}

module attributes {stable_mosaic.version = 11 : i64} {
  func.func @_attn_out_ffn_kernel(%arg0: i32, %arg1: memref<16x32xbf16, #tpu.memory_space<vmem>>, %arg2: memref<16x32xbf16, #tpu.memory_space<vmem>>, %arg3: memref<32x32xbf16, #tpu.memory_space<vmem>>, %arg4: memref<1x32xf32, #tpu.memory_space<vmem>>, %arg5: memref<1x32xf32, #tpu.memory_space<vmem>>, %arg6: memref<1x32xf32, #tpu.memory_space<vmem>>, %arg7: memref<32x128xbf16, #tpu.memory_space<vmem>>, %arg8: memref<1x128xf32, #tpu.memory_space<vmem>>, %arg9: memref<128x32xbf16, #tpu.memory_space<vmem>>, %arg10: memref<1x32xf32, #tpu.memory_space<vmem>>, %arg11: memref<1x32xf32, #tpu.memory_space<vmem>>, %arg12: memref<1x32xf32, #tpu.memory_space<vmem>>, %arg13: memref<16x32xbf16, #tpu.memory_space<vmem>>) attributes {dimension_semantics = [#tpu.dimension_semantics<parallel>], iteration_bounds = array<i64: 1>, scalar_prefetch = 0 : i64, scratch_operands = 0 : i64, tpu.core_type = #tpu.core_type<tc>, window_params = [{transform_indices = @transform_0, window_bounds = array<i64: 16, 32>}, {transform_indices = @transform_1, window_bounds = array<i64: 16, 32>}, {pipeline_mode = #tpu.pipeline_mode<synchronous>, transform_indices = @transform_2, window_bounds = array<i64: 32, 32>}, {pipeline_mode = #tpu.pipeline_mode<synchronous>, transform_indices = @transform_3, window_bounds = array<i64: 1, 32>}, {pipeline_mode = #tpu.pipeline_mode<synchronous>, transform_indices = @transform_4, window_bounds = array<i64: 1, 32>}, {pipeline_mode = #tpu.pipeline_mode<synchronous>, transform_indices = @transform_5, window_bounds = array<i64: 1, 32>}, {pipeline_mode = #tpu.pipeline_mode<synchronous>, transform_indices = @transform_6, window_bounds = array<i64: 32, 128>}, {pipeline_mode = #tpu.pipeline_mode<synchronous>, transform_indices = @transform_7, window_bounds = array<i64: 1, 128>}, {pipeline_mode = #tpu.pipeline_mode<synchronous>, transform_indices = @transform_8, window_bounds = array<i64: 128, 32>}, {pipeline_mode = #tpu.pipeline_mode<synchronous>, transform_indices = @transform_9, window_bounds = array<i64: 1, 32>}, {pipeline_mode = #tpu.pipeline_mode<synchronous>, transform_indices = @transform_10, window_bounds = array<i64: 1, 32>}, {pipeline_mode = #tpu.pipeline_mode<synchronous>, transform_indices = @transform_11, window_bounds = array<i64: 1, 32>}, {transform_indices = @transform_12, window_bounds = array<i64: 16, 32>}]} {
    %c0 = arith.constant 0 : index
    %c0_0 = arith.constant 0 : index
    %0 = vector.load %arg1[%c0, %c0_0] : memref<16x32xbf16, #tpu.memory_space<vmem>>, vector<16x32xbf16>
    %c0_1 = arith.constant 0 : index
    %c0_2 = arith.constant 0 : index
    %1 = vector.load %arg3[%c0_1, %c0_2] : memref<32x32xbf16, #tpu.memory_space<vmem>>, vector<32x32xbf16>
    %cst = arith.constant dense<0.000000e+00> : vector<16x32xf32>
    %2 = tpu.matmul %0, %1, %cst {dimension_numbers = #tpu.dot_dimension_numbers<[1], [0], [0], [1], [0, 0, 1, 1], [], []>} : vector<16x32xbf16>, vector<32x32xbf16>, vector<16x32xf32> -> vector<16x32xf32>
    %c0_3 = arith.constant 0 : index
    %c0_4 = arith.constant 0 : index
    %3 = vector.load %arg4[%c0_3, %c0_4] : memref<1x32xf32, #tpu.memory_space<vmem>>, vector<1x32xf32>
    %4 = vector.broadcast %3 : vector<1x32xf32> to vector<16x32xf32>
    %5 = arith.addf %2, %4 : vector<16x32xf32>
    %c0_5 = arith.constant 0 : index
    %c0_6 = arith.constant 0 : index
    %6 = vector.load %arg2[%c0_5, %c0_6] : memref<16x32xbf16, #tpu.memory_space<vmem>>, vector<16x32xbf16>
    %7 = arith.extf %6 : vector<16x32xbf16> to vector<16x32xf32>
    %8 = arith.addf %5, %7 : vector<16x32xf32>
    %c0_7 = arith.constant 0 : index
    %c0_8 = arith.constant 0 : index
    %9 = vector.load %arg5[%c0_7, %c0_8] : memref<1x32xf32, #tpu.memory_space<vmem>>, vector<1x32xf32>
    %c0_9 = arith.constant 0 : index
    %c0_10 = arith.constant 0 : index
    %10 = vector.load %arg6[%c0_9, %c0_10] : memref<1x32xf32, #tpu.memory_space<vmem>>, vector<1x32xf32>
    %cst_11 = arith.constant dense<0.000000e+00> : vector<16xf32>
    %11 = vector.multi_reduction <add>, %8, %cst_11 [1] : vector<16x32xf32> to vector<16xf32>
    %12 = vector.shape_cast %11 : vector<16xf32> to vector<16x1xf32>
    %cst_12 = arith.constant 3.200000e+01 : f32
    %13 = vector.broadcast %cst_12 : f32 to vector<16x1xf32>
    %14 = arith.divf %12, %13 : vector<16x1xf32>
    %15 = vector.broadcast %14 : vector<16x1xf32> to vector<16x32xf32>
    %16 = arith.subf %8, %15 : vector<16x32xf32>
    %17 = arith.mulf %16, %16 : vector<16x32xf32>
    %cst_13 = arith.constant dense<0.000000e+00> : vector<16xf32>
    %18 = vector.multi_reduction <add>, %17, %cst_13 [1] : vector<16x32xf32> to vector<16xf32>
    %19 = vector.shape_cast %18 : vector<16xf32> to vector<16x1xf32>
    %cst_14 = arith.constant 3.200000e+01 : f32
    %20 = vector.broadcast %cst_14 : f32 to vector<16x1xf32>
    %21 = arith.divf %19, %20 : vector<16x1xf32>
    %22 = vector.broadcast %14 : vector<16x1xf32> to vector<16x32xf32>
    %23 = arith.subf %8, %22 : vector<16x32xf32>
    %cst_15 = arith.constant 9.99999996E-13 : f32
    %24 = vector.broadcast %cst_15 : f32 to vector<16x1xf32>
    %25 = arith.addf %21, %24 : vector<16x1xf32>
    %26 = math.rsqrt %25 : vector<16x1xf32>
    %27 = vector.broadcast %26 : vector<16x1xf32> to vector<16x32xf32>
    %28 = arith.mulf %23, %27 : vector<16x32xf32>
    %29 = vector.broadcast %9 : vector<1x32xf32> to vector<16x32xf32>
    %30 = arith.mulf %28, %29 : vector<16x32xf32>
    %31 = vector.broadcast %10 : vector<1x32xf32> to vector<16x32xf32>
    %32 = arith.addf %30, %31 : vector<16x32xf32>
    %33 = arith.truncf %32 : vector<16x32xf32> to vector<16x32xbf16>
    %c0_16 = arith.constant 0 : index
    %c0_17 = arith.constant 0 : index
    %34 = vector.load %arg7[%c0_16, %c0_17] : memref<32x128xbf16, #tpu.memory_space<vmem>>, vector<32x128xbf16>
    %cst_18 = arith.constant dense<0.000000e+00> : vector<16x128xf32>
    %35 = tpu.matmul %33, %34, %cst_18 {dimension_numbers = #tpu.dot_dimension_numbers<[1], [0], [0], [1], [0, 0, 1, 1], [], []>} : vector<16x32xbf16>, vector<32x128xbf16>, vector<16x128xf32> -> vector<16x128xf32>
    %c0_19 = arith.constant 0 : index
    %c0_20 = arith.constant 0 : index
    %36 = vector.load %arg8[%c0_19, %c0_20] : memref<1x128xf32, #tpu.memory_space<vmem>>, vector<1x128xf32>
    %37 = vector.broadcast %36 : vector<1x128xf32> to vector<16x128xf32>
    %38 = arith.addf %35, %37 : vector<16x128xf32>
    %39 = arith.mulf %38, %38 : vector<16x128xf32>
    %40 = arith.mulf %38, %39 : vector<16x128xf32>
    %cst_21 = arith.constant 4.471500e-02 : f32
    %41 = vector.broadcast %cst_21 : f32 to vector<16x128xf32>
    %42 = arith.mulf %41, %40 : vector<16x128xf32>
    %43 = arith.addf %38, %42 : vector<16x128xf32>
    %cst_22 = arith.constant 0.797884583 : f32
    %44 = vector.broadcast %cst_22 : f32 to vector<16x128xf32>
    %45 = arith.mulf %44, %43 : vector<16x128xf32>
    %46 = math.tanh %45 : vector<16x128xf32>
    %cst_23 = arith.constant 1.000000e+00 : f32
    %47 = vector.broadcast %cst_23 : f32 to vector<16x128xf32>
    %48 = arith.addf %47, %46 : vector<16x128xf32>
    %cst_24 = arith.constant 5.000000e-01 : f32
    %49 = vector.broadcast %cst_24 : f32 to vector<16x128xf32>
    %50 = arith.mulf %49, %48 : vector<16x128xf32>
    %51 = arith.mulf %38, %50 : vector<16x128xf32>
    %52 = arith.truncf %51 : vector<16x128xf32> to vector<16x128xbf16>
    %c0_25 = arith.constant 0 : index
    %c0_26 = arith.constant 0 : index
    %53 = vector.load %arg9[%c0_25, %c0_26] : memref<128x32xbf16, #tpu.memory_space<vmem>>, vector<128x32xbf16>
    %cst_27 = arith.constant dense<0.000000e+00> : vector<16x32xf32>
    %54 = tpu.matmul %52, %53, %cst_27 {dimension_numbers = #tpu.dot_dimension_numbers<[1], [0], [0], [1], [0, 0, 1, 1], [], []>} : vector<16x128xbf16>, vector<128x32xbf16>, vector<16x32xf32> -> vector<16x32xf32>
    %c0_28 = arith.constant 0 : index
    %c0_29 = arith.constant 0 : index
    %55 = vector.load %arg10[%c0_28, %c0_29] : memref<1x32xf32, #tpu.memory_space<vmem>>, vector<1x32xf32>
    %56 = vector.broadcast %55 : vector<1x32xf32> to vector<16x32xf32>
    %57 = arith.addf %54, %56 : vector<16x32xf32>
    %58 = arith.addf %57, %32 : vector<16x32xf32>
    %c0_30 = arith.constant 0 : index
    %c0_31 = arith.constant 0 : index
    %59 = vector.load %arg11[%c0_30, %c0_31] : memref<1x32xf32, #tpu.memory_space<vmem>>, vector<1x32xf32>
    %c0_32 = arith.constant 0 : index
    %c0_33 = arith.constant 0 : index
    %60 = vector.load %arg12[%c0_32, %c0_33] : memref<1x32xf32, #tpu.memory_space<vmem>>, vector<1x32xf32>
    %cst_34 = arith.constant dense<0.000000e+00> : vector<16xf32>
    %61 = vector.multi_reduction <add>, %58, %cst_34 [1] : vector<16x32xf32> to vector<16xf32>
    %62 = vector.shape_cast %61 : vector<16xf32> to vector<16x1xf32>
    %cst_35 = arith.constant 3.200000e+01 : f32
    %63 = vector.broadcast %cst_35 : f32 to vector<16x1xf32>
    %64 = arith.divf %62, %63 : vector<16x1xf32>
    %65 = vector.broadcast %64 : vector<16x1xf32> to vector<16x32xf32>
    %66 = arith.subf %58, %65 : vector<16x32xf32>
    %67 = arith.mulf %66, %66 : vector<16x32xf32>
    %cst_36 = arith.constant dense<0.000000e+00> : vector<16xf32>
    %68 = vector.multi_reduction <add>, %67, %cst_36 [1] : vector<16x32xf32> to vector<16xf32>
    %69 = vector.shape_cast %68 : vector<16xf32> to vector<16x1xf32>
    %cst_37 = arith.constant 3.200000e+01 : f32
    %70 = vector.broadcast %cst_37 : f32 to vector<16x1xf32>
    %71 = arith.divf %69, %70 : vector<16x1xf32>
    %72 = vector.broadcast %64 : vector<16x1xf32> to vector<16x32xf32>
    %73 = arith.subf %58, %72 : vector<16x32xf32>
    %cst_38 = arith.constant 9.99999996E-13 : f32
    %74 = vector.broadcast %cst_38 : f32 to vector<16x1xf32>
    %75 = arith.addf %71, %74 : vector<16x1xf32>
    %76 = math.rsqrt %75 : vector<16x1xf32>
    %77 = vector.broadcast %76 : vector<16x1xf32> to vector<16x32xf32>
    %78 = arith.mulf %73, %77 : vector<16x32xf32>
    %79 = vector.broadcast %59 : vector<1x32xf32> to vector<16x32xf32>
    %80 = arith.mulf %78, %79 : vector<16x32xf32>
    %81 = vector.broadcast %60 : vector<1x32xf32> to vector<16x32xf32>
    %82 = arith.addf %80, %81 : vector<16x32xf32>
    %83 = arith.truncf %82 : vector<16x32xf32> to vector<16x32xbf16>
    %c0_39 = arith.constant 0 : index
    %c0_40 = arith.constant 0 : index
    %84 = vector.load %arg13[%c0_39, %c0_40] : memref<16x32xbf16, #tpu.memory_space<vmem>>, vector<16x32xbf16>
    tpu.vector_store %arg13[%c0_39, %c0_40], %83 {strides = array<i32>} : memref<16x32xbf16, #tpu.memory_space<vmem>>, vector<16x32xbf16>,
    return
  }
  func.func @transform_0(%arg0: i32) -> (i32, i32) {
    %c0_i32 = arith.constant 0 : i32
    %c0_i32_0 = arith.constant 0 : i32
    return %arg0, %c0_i32 : i32, i32
  }
  func.func @transform_1(%arg0: i32) -> (i32, i32) {
    %c0_i32 = arith.constant 0 : i32
    %c0_i32_0 = arith.constant 0 : i32
    return %arg0, %c0_i32 : i32, i32
  }
  func.func @transform_2(%arg0: i32) -> (i32, i32) {
    %c0_i32 = arith.constant 0 : i32
    %c0_i32_0 = arith.constant 0 : i32
    %c0_i32_1 = arith.constant 0 : i32
    return %c0_i32, %c0_i32_0 : i32, i32
  }
  func.func @transform_3(%arg0: i32) -> (i32, i32) {
    %c0_i32 = arith.constant 0 : i32
    %c0_i32_0 = arith.constant 0 : i32
    %c0_i32_1 = arith.constant 0 : i32
    return %c0_i32, %c0_i32_0 : i32, i32
  }
  func.func @transform_4(%arg0: i32) -> (i32, i32) {
    %c0_i32 = arith.constant 0 : i32
    %c0_i32_0 = arith.constant 0 : i32
    %c0_i32_1 = arith.constant 0 : i32
    return %c0_i32, %c0_i32_0 : i32, i32
  }
  func.func @transform_5(%arg0: i32) -> (i32, i32) {
    %c0_i32 = arith.constant 0 : i32
    %c0_i32_0 = arith.constant 0 : i32
    %c0_i32_1 = arith.constant 0 : i32
    return %c0_i32, %c0_i32_0 : i32, i32
  }
  func.func @transform_6(%arg0: i32) -> (i32, i32) {
    %c0_i32 = arith.constant 0 : i32
    %c0_i32_0 = arith.constant 0 : i32
    %c0_i32_1 = arith.constant 0 : i32
    return %c0_i32, %c0_i32_0 : i32, i32
  }
  func.func @transform_7(%arg0: i32) -> (i32, i32) {
    %c0_i32 = arith.constant 0 : i32
    %c0_i32_0 = arith.constant 0 : i32
    %c0_i32_1 = arith.constant 0 : i32
    return %c0_i32, %c0_i32_0 : i32, i32
  }
  func.func @transform_8(%arg0: i32) -> (i32, i32) {
    %c0_i32 = arith.constant 0 : i32
    %c0_i32_0 = arith.constant 0 : i32
    %c0_i32_1 = arith.constant 0 : i32
    return %c0_i32, %c0_i32_0 : i32, i32
  }
  func.func @transform_9(%arg0: i32) -> (i32, i32) {
    %c0_i32 = arith.constant 0 : i32
    %c0_i32_0 = arith.constant 0 : i32
    %c0_i32_1 = arith.constant 0 : i32
    return %c0_i32, %c0_i32_0 : i32, i32
  }
  func.func @transform_10(%arg0: i32) -> (i32, i32) {
    %c0_i32 = arith.constant 0 : i32
    %c0_i32_0 = arith.constant 0 : i32
    %c0_i32_1 = arith.constant 0 : i32
    return %c0_i32, %c0_i32_0 : i32, i32
  }
  func.func @transform_11(%arg0: i32) -> (i32, i32) {
    %c0_i32 = arith.constant 0 : i32
    %c0_i32_0 = arith.constant 0 : i32
    %c0_i32_1 = arith.constant 0 : i32
    return %c0_i32, %c0_i32_0 : i32, i32
  }
  func.func @transform_12(%arg0: i32) -> (i32, i32) {
    %c0_i32 = arith.constant 0 : i32
    %c0_i32_0 = arith.constant 0 : i32
    return %arg0, %c0_i32 : i32, i32
  }
}

module attributes {stable_mosaic.version = 11 : i64} {
  func.func @_pool_classify_kernel(%arg0: i32, %arg1: memref<1x8x32xbf16, #tpu.memory_space<vmem>>, %arg2: memref<1x1x8xf32, #tpu.memory_space<vmem>>, %arg3: memref<1x32xbf16, #tpu.memory_space<vmem>>, %arg4: memref<1x1xf32, #tpu.memory_space<vmem>>, %arg5: memref<32x4xbf16, #tpu.memory_space<vmem>>, %arg6: memref<1x4xf32, #tpu.memory_space<vmem>>, %arg7: memref<1x1x4xf32, #tpu.memory_space<vmem>>) attributes {dimension_semantics = [#tpu.dimension_semantics<parallel>], iteration_bounds = array<i64: 2>, scalar_prefetch = 0 : i64, scratch_operands = 0 : i64, tpu.core_type = #tpu.core_type<tc>, window_params = [{transform_indices = @transform_0, window_bounds = array<i64: 1, 8, 32>}, {transform_indices = @transform_1, window_bounds = array<i64: 1, 1, 8>}, {pipeline_mode = #tpu.pipeline_mode<synchronous>, transform_indices = @transform_2, window_bounds = array<i64: 1, 32>}, {pipeline_mode = #tpu.pipeline_mode<synchronous>, transform_indices = @transform_3, window_bounds = array<i64: 1, 1>}, {pipeline_mode = #tpu.pipeline_mode<synchronous>, transform_indices = @transform_4, window_bounds = array<i64: 32, 4>}, {pipeline_mode = #tpu.pipeline_mode<synchronous>, transform_indices = @transform_5, window_bounds = array<i64: 1, 4>}, {transform_indices = @transform_6, window_bounds = array<i64: 1, 1, 4>}]} {
    %c0 = arith.constant 0 : index
    %c0_0 = arith.constant 0 : index
    %c0_1 = arith.constant 0 : index
    %0 = vector.load %arg1[%c0, %c0_0, %c0_1] : memref<1x8x32xbf16, #tpu.memory_space<vmem>>, vector<1x8x32xbf16>
    %1 = vector.shape_cast %0 : vector<1x8x32xbf16> to vector<8x32xbf16>
    %c0_2 = arith.constant 0 : index
    %c0_3 = arith.constant 0 : index
    %2 = vector.load %arg3[%c0_2, %c0_3] : memref<1x32xbf16, #tpu.memory_space<vmem>>, vector<1x32xbf16>
    %cst = arith.constant dense<0.000000e+00> : vector<1x8xf32>
    %3 = tpu.matmul %2, %1, %cst {dimension_numbers = #tpu.dot_dimension_numbers<[1], [1], [0], [0], [0, 0, 1, 0], [], []>} : vector<1x32xbf16>, vector<8x32xbf16>, vector<1x8xf32> -> vector<1x8xf32>
    %c0_4 = arith.constant 0 : index
    %c0_5 = arith.constant 0 : index
    %4 = vector.load %arg4[%c0_4, %c0_5] : memref<1x1xf32, #tpu.memory_space<vmem>>, vector<1x1xf32>
    %5 = vector.broadcast %4 : vector<1x1xf32> to vector<1x8xf32>
    %6 = arith.addf %3, %5 : vector<1x8xf32>
    %c0_6 = arith.constant 0 : index
    %c0_7 = arith.constant 0 : index
    %c0_8 = arith.constant 0 : index
    %7 = vector.load %arg2[%c0_6, %c0_7, %c0_8] : memref<1x1x8xf32, #tpu.memory_space<vmem>>, vector<1x1x8xf32>
    %8 = vector.shape_cast %7 : vector<1x1x8xf32> to vector<1x8xf32>
    %9 = arith.addf %6, %8 : vector<1x8xf32>
    %cst_9 = arith.constant dense<0xFF800000> : vector<1xf32>
    %10 = vector.multi_reduction <maximumf>, %9, %cst_9 [1] : vector<1x8xf32> to vector<1xf32>
    %11 = vector.shape_cast %10 : vector<1xf32> to vector<1x1xf32>
    %12 = vector.broadcast %11 : vector<1x1xf32> to vector<1x8xf32>
    %13 = arith.subf %9, %12 : vector<1x8xf32>
    %14 = math.exp %13 : vector<1x8xf32>
    %cst_10 = arith.constant dense<0.000000e+00> : vector<1xf32>
    %15 = vector.multi_reduction <add>, %14, %cst_10 [1] : vector<1x8xf32> to vector<1xf32>
    %16 = vector.shape_cast %15 : vector<1xf32> to vector<1x1xf32>
    %17 = vector.broadcast %16 : vector<1x1xf32> to vector<1x8xf32>
    %18 = arith.divf %14, %17 : vector<1x8xf32>
    %19 = arith.truncf %18 : vector<1x8xf32> to vector<1x8xbf16>
    %cst_11 = arith.constant dense<0.000000e+00> : vector<1x32xf32>
    %20 = tpu.matmul %19, %1, %cst_11 {dimension_numbers = #tpu.dot_dimension_numbers<[1], [0], [0], [1], [0, 0, 1, 1], [], []>} : vector<1x8xbf16>, vector<8x32xbf16>, vector<1x32xf32> -> vector<1x32xf32>
    %21 = arith.truncf %20 : vector<1x32xf32> to vector<1x32xbf16>
    %c0_12 = arith.constant 0 : index
    %c0_13 = arith.constant 0 : index
    %22 = vector.load %arg5[%c0_12, %c0_13] : memref<32x4xbf16, #tpu.memory_space<vmem>>, vector<32x4xbf16>
    %cst_14 = arith.constant dense<0.000000e+00> : vector<1x4xf32>
    %23 = tpu.matmul %21, %22, %cst_14 {dimension_numbers = #tpu.dot_dimension_numbers<[1], [0], [0], [1], [0, 0, 1, 1], [], []>} : vector<1x32xbf16>, vector<32x4xbf16>, vector<1x4xf32> -> vector<1x4xf32>
    %c0_15 = arith.constant 0 : index
    %c0_16 = arith.constant 0 : index
    %24 = vector.load %arg6[%c0_15, %c0_16] : memref<1x4xf32, #tpu.memory_space<vmem>>, vector<1x4xf32>
    %25 = arith.addf %23, %24 : vector<1x4xf32>
    %c0_17 = arith.constant 0 : index
    %c0_18 = arith.constant 0 : index
    %c0_19 = arith.constant 0 : index
    %26 = vector.load %arg7[%c0_17, %c0_18, %c0_19] : memref<1x1x4xf32, #tpu.memory_space<vmem>>, vector<1x1x4xf32>
    %27 = vector.shape_cast %26 : vector<1x1x4xf32> to vector<1x4xf32>
    %28 = vector.shape_cast %25 : vector<1x4xf32> to vector<1x1x4xf32>
    tpu.vector_store %arg7[%c0_17, %c0_18, %c0_19], %28 {strides = array<i32>} : memref<1x1x4xf32, #tpu.memory_space<vmem>>, vector<1x1x4xf32>,
    return
  }
  func.func @transform_0(%arg0: i32) -> (i32, i32, i32) {
    %c0_i32 = arith.constant 0 : i32
    %c0_i32_0 = arith.constant 0 : i32
    %c0_i32_1 = arith.constant 0 : i32
    return %arg0, %c0_i32, %c0_i32_0 : i32, i32, i32
  }
  func.func @transform_1(%arg0: i32) -> (i32, i32, i32) {
    %c0_i32 = arith.constant 0 : i32
    %c0_i32_0 = arith.constant 0 : i32
    %c0_i32_1 = arith.constant 0 : i32
    return %arg0, %c0_i32, %c0_i32_0 : i32, i32, i32
  }
  func.func @transform_2(%arg0: i32) -> (i32, i32) {
    %c0_i32 = arith.constant 0 : i32
    %c0_i32_0 = arith.constant 0 : i32
    %c0_i32_1 = arith.constant 0 : i32
    return %c0_i32, %c0_i32_0 : i32, i32
  }
  func.func @transform_3(%arg0: i32) -> (i32, i32) {
    %c0_i32 = arith.constant 0 : i32
    %c0_i32_0 = arith.constant 0 : i32
    %c0_i32_1 = arith.constant 0 : i32
    return %c0_i32, %c0_i32_0 : i32, i32
  }
  func.func @transform_4(%arg0: i32) -> (i32, i32) {
    %c0_i32 = arith.constant 0 : i32
    %c0_i32_0 = arith.constant 0 : i32
    %c0_i32_1 = arith.constant 0 : i32
    return %c0_i32, %c0_i32_0 : i32, i32
  }
  func.func @transform_5(%arg0: i32) -> (i32, i32) {
    %c0_i32 = arith.constant 0 : i32
    %c0_i32_0 = arith.constant 0 : i32
    %c0_i32_1 = arith.constant 0 : i32
    return %c0_i32, %c0_i32_0 : i32, i32
  }
  func.func @transform_6(%arg0: i32) -> (i32, i32, i32) {
    %c0_i32 = arith.constant 0 : i32
    %c0_i32_0 = arith.constant 0 : i32
    %c0_i32_1 = arith.constant 0 : i32
    return %arg0, %c0_i32, %c0_i32_0 : i32, i32, i32
  }
}

</mosaic_0001>

<bundles_post_ra>
// kernel: protein_bigbird_attention_forward.5
= control target key start
LH: loop header
LB: loop body
LE: loop exit
PB: predicated region body
PF: predicated region fallthrough
CT: control target
= control target key end

     0   :  { %s452_s21 = smov 0   ;;  %s490_s0 = inlined_call_operand.vmem [shape: f32[16,16], index: 0, kind: input, shape index: {}]   ;;  %s491_s1 = inlined_call_operand.vmem [shape: bf16[16,32], index: 1, kind: input, shape index: {}]   ;;  %s492_s2 = inlined_call_operand.vmem [shape: f32[1,32], index: 2, kind: input, shape index: {}]   ;;  %s493_s3 = inlined_call_operand.vmem [shape: f32[64,32], index: 3, kind: input, shape index: {}]   ;;  %s494_s4 = inlined_call_operand.vmem [shape: f32[1,32], index: 4, kind: input, shape index: {}]   ;;  %s495_s5 = inlined_call_operand.vmem [shape: f32[1,32], index: 5, kind: input, shape index: {}]   ;;  %s496_s6 = inlined_call_operand.vmem [shape: bf16[16,32], index: 6, kind: output, shape index: {}]  }
   0x1 LB: > { %s377_s22 = sadd.s32 4294967295, %s414_s21   ;;  %p381_p0 = scmp.ge.s32.totalorder %s414_s21, 1  ;;  %s414_s21 = sphi %s452_s21, %s16_s21  }
   0x2   : > { %p211_p1 = scmp.lt.s32.totalorder %s414_s21, 3 }
   0x4   : > { %p212_p2 = pnand %p381_p0, %p211_p1 }
   0x5   : > { %p239_p3 = scmp.lt.s32.totalorder (!%p212_p2), %s377_s22, 1 }
   0x6   : > { %215 = sbr.rel (%p212_p2) target bundleno = 418 (0x1a2), region = 44 }
   0xb   : > { %v391_v0 = vld [vmem:[%s491_s1] sm:$0xff]  ;;  %s498_s22 = smov (!%p239_p3, %s377_s22), 1  ;;  %vm262_vm0 = vcmask 130048   ;;  %vm283_vm1 = vcmask 261120   ;;  %v416_v10 = vmov 32.0   ;;  %vm322_vm6 = vcmask 257024  }
   0xc   : > { %273 = vmatpush.bf16.msra.mxu0 %v391_v0  ;;  %s382_s25 = sshll.u32 %s498_s22, 3  ;;  %v401_v3 = vld [vmem:[%s492_s2] ss:$0 sm:$0xff]  ;;  %404 = vrcp.f32 %v416_v10  ;;  %s383_s13 = sshll.u32 %s498_s22, 2 }
   0xd   : > { %s242_s28 = scalar_lea.vmem %s490_s0, %s382_s25  ;;  %v279_v5 = vld [vmem:[%s493_s3] sm:$0xff]  ;;  %s246_s16 = scalar_lea.vmem %s496_s6, %s383_s13 }
   0xe   : > { %v248_v1 = vld [vmem:[%s242_s28] sm:$0xff] }
   0xf   : > { %v249_v2 = vpack.c.bf16 %v248_v1, %v248_v1  ;;  %v402_v31 = vld [vmem:[%s494_s4] ss:$0 sm:$0xff] }
  0x10   : > { %v403_v33 = vld [vmem:[%s495_s5] ss:$0 sm:$0xff] }
  0x11   : > { %388 = vmatmul.msk.bf16.vlgmr.msra.gmra.mxu0 %vm262_vm0, %v249_v2 }
  0x12   : > { %v405_v11 = vpop.eup %404 }
  0x13   : > { %v288_v12 = vmul.f32 32.0, %v405_v11  ;;  %vm292_vm2 = vweird.f32 %v405_v11 }
  0x15   : > { %v289_v13 = vsub.f32 1.0, %v288_v12 }
  0x17   : > { %v290_v14 = vmul.f32 %v405_v11, %v289_v13 }
  0x19   : > { %v291_v15 = vadd.f32 %v405_v11, %v290_v14 }
  0x1b   : > { %v293_v16 = vsel %vm292_vm2, %v405_v11, %v291_v15 }
  0x8e   : > { %v275_v4 = vpop.f32.mrf.mxu0 }
  0x8f   : > { %v276_v6 = vadd.f32 %v401_v3, %v275_v4 }
  0x91   : > { %v280_v7 = vadd.f32 %v279_v5, %v276_v6 }
  0x93   : > { %v284_v8 = vsel %vm283_vm1, %v280_v7, 0.0 }
  0x94   : > { %285 = vadd.xlane.f32.xlu0 %v284_v8 }
  0x96   : > { %v277_v9 = vpop.f32.mrf.mxu0 }
 0x107   : > { %v286_v17 = vpop.xlane.xlu0 %285 }
 0x108   : > { %v294_v18 = vmul.f32 %v293_v16, %v286_v17 }
 0x10a   : > { %v295_v19 = vsub.f32 %v280_v7, %v294_v18 }
 0x10c   : > { %v296_v20 = vmul.f32 %v295_v19, %v295_v19 }
 0x10e   : > { %v297_v21 = vsel %vm283_vm1, %v296_v20, 0.0 }
 0x10f   : > { %298 = vadd.xlane.f32.xlu0 %v297_v21 }
 0x182   : > { %v299_v22 = vpop.xlane.xlu0 %298 }
 0x183   : > { %v300_v23 = vmul.f32 %v299_v22, %v293_v16 }
 0x185   : > { %v301_v24 = vadd.f32 1e-12, %v300_v23 }
 0x187   : > { %406 = vrsqrt.f32 %v301_v24  ;;  %vm308_vm4 = vweird.f32 %v301_v24 }
 0x18d   : > { %v407_v25 = vpop.eup %406 }
 0x18e   : > { %v303_v26 = vmul.f32 %v407_v25, %v301_v24  ;;  %vm309_vm3 = vweird.f32 %v407_v25 }
 0x18f   : > { %vm310_vm5 = vmor %vm308_vm4, %vm309_vm3 }
 0x190   : > { %v304_v27 = vmul.f32 %v407_v25, %v303_v26 }
 0x192   : > { %v305_v28 = vmul.f32 0.5, %v304_v27 }
 0x194   : > { %v306_v29 = vsub.f32 1.5, %v305_v28 }
 0x196   : > { %v307_v30 = vmul.f32 %v407_v25, %v306_v29 }
 0x198   : > { %v311_v32 = vsel %vm310_vm5, %v407_v25, %v307_v30 }
 0x199   : > { %v312_v34 = vmul.f32 %v311_v32, %v295_v19 }
 0x19b   : > { %v316_v35 = vmul.f32 %v402_v31, %v312_v34 }
 0x19d   : > { %v320_v36 = vadd.f32 %v403_v33, %v316_v35 }
 0x19f   : > { %v321_v37 = vpack.c.bf16 %v320_v36, %v320_v36 }
 0x1a1   : > { %323 = vst.msk [vmem:[%s246_s16] sm:$0xf] %vm322_vm6, %v321_v37 }
 0x1a2 PF: > { %s16_s21 = sadd.s32 1, %s414_s21  }
 0x1a3   : > { %p13_p4 = scmp.ge.s32.totalorder %s16_s21, 4  }
 0x1a5   :  { %15 = sbr.rel (!%p13_p4) target bundleno = 1 (0x1), region = 74 }

// kernel: protein_bigbird_attention_forward.6
= control target key start
LH: loop header
LB: loop body
LE: loop exit
PB: predicated region body
PF: predicated region fallthrough
CT: control target
= control target key end

     0   :  { %vm45_vm0 = vcmask 261120   ;;  %vm65_vm1 = vcmask 257024   ;;  %s118_s28 = smov 96   ;;  %s185_s1 = inlined_call_operand.vmem [shape: bf16[32,96], index: 1, kind: input, shape index: {}]   ;;  %s186_s2 = inlined_call_operand.vmem [shape: f32[1,96], index: 2, kind: input, shape index: {}]   ;;  %s187_s0 = inlined_call_operand.vmem [shape: bf16[16,32], index: 0, kind: input, shape index: {}]   ;;  %s188_s3 = inlined_call_operand.vmem [shape: bf16[16,32], index: 3, kind: output, shape index: {0}]   ;;  %s189_s5 = inlined_call_operand.vmem [shape: bf16[16,32], index: 5, kind: output, shape index: {2}]   ;;  %s190_s4 = inlined_call_operand.vmem [shape: bf16[16,32], index: 4, kind: output, shape index: {1}]  }
   0x1   :  { %v113_v0 = vld [vmem:[%s185_s1 + $0x8] sm:$0xff]  ;;  %v112_v1 = vld [vmem:[%s185_s1] sm:$0xff]  ;;  %s117_s1 = smov 64  }
   0x2   :  { %55 = vmatpush.bf16.msra.mxu0 %v113_v0  ;;  %v111_v2 = vld [vmem:[%s187_s0] sm:$0xff] }
   0x3   :  { %v116_v3 = vld [vmem:[%s186_s2] ss:$0 sm:$0xff] }
   0x6   :  { %56 = vmatpush.bf16.msra.mxu0 %v112_v1 }
   0x9   :  { %110 = vmatmul.msk.bf16.vlgmr.msra.gmra.mxu0 %vm45_vm0, %v111_v2 }
  0x86   :  { %v58_v4 = vpop.f32.mrf.mxu0 }
  0x87   :  { %v59_v5 = vadd.f32 %v116_v3, %v58_v4 }
  0x89   :  { %v63_v6 = vpack.c.bf16 %v59_v5, %v59_v5 }
  0x8b   :  { %66 = vst.msk [vmem:[%s188_s3] sm:$0xf] %vm65_vm1, %v63_v6  ;;  %78 = vrot.lane.b32.xlu1 %v63_v6, %s117_s1  ;;  %70 = vrot.lane.b32.xlu0 %v63_v6, %s118_s28 }
  0x8e   :  { %v60_v7 = vpop.f32.mrf.mxu0 }
  0x8f   :  { %v61_v8 = vadd.f32 %v116_v3, %v60_v7 }
  0x91   :  { %v64_v9 = vpack.c.bf16 %v61_v8, %v61_v8 }
  0x93   :  { %67 = vst.msk [vmem:[%s188_s3 + $0x4] sm:$0xf] %vm65_vm1, %v64_v9  ;;  %80 = vrot.lane.b32.xlu1 %v64_v9, %s117_s1  ;;  %72 = vrot.lane.b32.xlu0 %v64_v9, %s118_s28 }
  0xfd   :  { %v79_v10 = vpop.permute.xlu1 %78  ;;  %v71_v11 = vpop.permute.xlu0 %70 }
  0xfe   :  { %84 = vst.msk [vmem:[%s189_s5] sm:$0xf] %vm65_vm1, %v79_v10 }
  0xff   :  { %76 = vst.msk [vmem:[%s190_s4] sm:$0xf] %vm65_vm1, %v71_v11 }
 0x105   :  { %v81_v12 = vpop.permute.xlu1 %80  ;;  %v73_v13 = vpop.permute.xlu0 %72 }
 0x106   :  { %85 = vst.msk [vmem:[%s189_s5 + $0x4] sm:$0xf] %vm65_vm1, %v81_v12 }
 0x107   :  { %77 = vst.msk [vmem:[%s190_s4 + $0x4] sm:$0xf] %vm65_vm1, %v73_v13 }

// kernel: protein_bigbird_attention_forward.7
= control target key start
LH: loop header
LB: loop body
LE: loop exit
PB: predicated region body
PF: predicated region fallthrough
CT: control target
= control target key end

     0   :  { %s959_s21 = smov [#allocation6]   ;;  %s1162_s0 = inlined_call_operand.vmem [shape: s32[2,1], index: 0, kind: input, shape index: {}]   ;;  %s1163_s1 = inlined_call_operand.vmem [shape: bf16[2,8,32], index: 1, kind: input, shape index: {}]   ;;  %s1164_s2 = inlined_call_operand.vmem [shape: bf16[2,8,32], index: 2, kind: input, shape index: {}]   ;;  %s1165_s3 = inlined_call_operand.vmem [shape: bf16[2,8,32], index: 3, kind: input, shape index: {}]   ;;  %s1166_s4 = inlined_call_operand.vmem [shape: f32[2,1,8], index: 4, kind: input, shape index: {}]   ;;  %s1167_s5 = inlined_call_operand.vmem [shape: bf16[2,8,32], index: 5, kind: output, shape index: {}]  }
   0x1   :  { %s11_s20 = sshll.u32 %s1162_s0, 4  ;;  %s12_s20 = int_to_ptr.vmem [resolvable:$true] %s11_s20 }
   0x2   :  { %14 = dma.vmem_to_smem %s12_s20, 32, %s959_s21, [#allocation5] }
   0x3   :  { %945 = dma.done.wait [#allocation5], 32 }
   0x4   :  { %946 = vsyncadd [#allocation5], 4294967264 }
   0x5   :  { %17 = sfence }
   0x6   :  { %s1005_s22 = smov 0   ;;  %s1007_s23 = smov 0  }
   0x7   :  { %s1009_s24 = smov 0  }
   0x8 LB: > { %s42_s0 = sadd.s32 1, %s953_s23  ;;  %p838_p0 = scmp.ge.s32.totalorder %s957_s24, 1  ;;  %s957_s24 = sphi %s1009_s24, %s23_s24   ;;  %s953_s23 = sphi %s1007_s23, %s1169_s23   ;;  %s949_s22 = sphi %s1005_s22, %s1168_s22  }
   0x9   : > { %p44_p1 = scmp.ge.s32.totalorder %s42_s0, 2  ;;  %p237_p2 = scmp.lt.s32.totalorder %s957_s24, 3 }
   0xb   : > { %s1171_s0 = smov (%p44_p1, %s42_s0), 0  ;;  %p238_p3 = pnand %p838_p0, %p237_p2 }
   0xc   : > { %p287_p4 = scmp.lt.s32.totalorder (!%p238_p3), %s949_s22, 1  ;;  %s843_s25 = sshll.u32 (!%p238_p3), %s949_s22, 7 }
   0xd   : > { %241 = sbr.rel (%p238_p3) target bundleno = 1180 (0x49c), region = 36  ;;  %s337_s26 = sld [smem:[#allocation6 + %s843_s25]] (!%p238_p3) }
  0x12   : > { %vm326_vm0 = vcmask 261120   ;;  %v960_v0 = vmov -inf   ;;  %s1173_s22 = smov (!%p287_p4, %s949_s22), 1  ;;  %v961_v1 = vmov 0.0  }
  0x13   : > { %327 = vst.msk [vmem:[#allocation2] sm:$0xff] %vm326_vm0, %v960_v0  ;;  %s1026_s27 = sshll.u32 %s1173_s22, 2  ;;  %s313_s30 = scalar_lea.vmem %s1166_s4, %s1173_s22 }
  0x14   : > { %328 = vst.msk [vmem:[#allocation3] sm:$0xff] %vm326_vm0, %v961_v1  ;;  %s293_s8 = scalar_lea.vmem %s1163_s1, %s1026_s27  ;;  %s300_s11 = scalar_lea.vmem %s1164_s2, %s1026_s27 }
  0x15   : > { %329 = vst.msk [vmem:[#allocation4] sm:$0xff] %vm326_vm0, %v961_v1  ;;  %s307_s14 = scalar_lea.vmem %s1165_s3, %s1026_s27  ;;  %s320_s17 = scalar_lea.vmem %s1167_s5, %s1026_s27 }
  0x16   : > { %p844_p5 = scmp.le.s32.totalorder %s337_s26, 0 }
  0x17   : > { %s962_s18 = smov (!%p844_p5), 112   ;;  %s963_s19 = smov (!%p844_p5), 104  }
  0x18   : > { %341 = sbr.rel (%p844_p5) target bundleno = 1151 (0x47f), region = 44  ;;  %s964_s20 = smov (!%p844_p5), 120  }
  0x19   : > { %s969_s25 = smov (!%p844_p5), 8   ;;  %s970_s26 = smov (!%p844_p5), 24  }
  0x1a   : > { %s971_s28 = smov (!%p844_p5), 16  }
  0x1d   : > { %v343_v2 = vld [vmem:[%s300_s11] sm:$0xf]  ;;  %vm352_vm1 = vcmask 64512   ;;  %v965_v14 = vmov 0   ;;  %vm396_vm2 = vcmask 1043456   ;;  %v966_v51 = vmov 8  }
  0x1e   : > { %v357_v3 = vsel %vm352_vm1, %v343_v2, 0  ;;  %v342_v4 = vld [vmem:[%s293_s8] sm:$0xf]  ;;  %v431_v5 = vunpack.c.l.b16 %v343_v2  ;;  %892 = vset.pattern.permute.xlu1 %v965_v14  ;;  %893 = vset.pattern.permute.xlu2 %v966_v51  ;;  %v967_v52 = vmov 16   ;;  %v968_v57 = vmov 24   ;;  %v1111_v1 = vld [vmem:[#allocation3] sm:$0xff] }
  0x1f   : > { %366 = vmatpush.bf16.xpose.msra.mxu0 %v357_v3  ;;  %v1049_v6 = vld [vmem:[%s313_s30] ss:$0 sm:$0xff]  ;;  %v426_v12 = vunpack.c.l.b16 %v342_v4  ;;  %894 = vset.pattern.permute.xlu0 %v967_v52  ;;  %vm678_vm3 = vcmask 130048   ;;  %vm680_vm4 = vcmask 195584  }
  0x20   : > { %v432_v8 = vpack.c.b16 %v431_v5, %v431_v5  ;;  %v1058_v15 = vld [vmem:[#allocation2] sm:$0xff] }
  0x21   : > { %v427_v13 = vpack.c.b16 %v426_v12, %v426_v12  ;;  %v344_v21 = vld [vmem:[%s307_s14] sm:$0xf] }
  0x22   : > { %517 = vrot.lane.b32.xlu2 %v432_v8, %s962_s18  ;;  %v398_v22 = vsel %vm396_vm2, %v344_v21, 0  ;;  %v476_v47 = vunpack.c.l.b16 %v344_v21 }
  0x23   : > { %407 = vmatpush.bf16.msra.mxu1 %v398_v22 }
  0x24   : > { %v477_v49 = vpack.c.b16 %v476_v47, %v476_v47 }
  0x26   : > { %845 = vmatmul.msk.bf16.vlgmr.msra.gmra.mxu0 %vm352_vm1, %v342_v4 }
  0x2a   : > { %598 = vrot.lane.b32.xlu2 %v432_v8, %s963_s19 }
  0x32   : > { %596 = vrot.lane.b32.xlu2 %v427_v13, %s963_s19 }
  0x7c   : > { %v518_v20 = vpop.permute.xlu2 %517 }
  0x7d   : > { %v523_v24 = vsel %vm352_vm1, %v518_v20, 0 }
  0x7e   : > { %532 = vmatpush.bf16.xpose.msrb.mxu1 %v523_v24 }
  0x84   : > { %v599_v23 = vpop.permute.xlu2 %598 }
  0x85   : > { %v604_v25 = vsel %vm352_vm1, %v599_v23, 0 }
  0x86   : > { %613 = vmatpush.bf16.xpose.msrb.mxu0 %v604_v25 }
  0x8c   : > { %v597_v26 = vpop.permute.xlu2 %596 }
  0x8d   : > { %851 = vmatmul.msk.bf16.vlgmr.msrb.gmra.mxu0 %vm352_vm1, %v597_v26 }
  0xa3   : > { %v368_v7 = vpop.f32.mrf.mxu0 }
  0xa4   : > { %v369_v9 = vadd.f32 %v1049_v6, %v368_v7 }
  0xa6   : > { %v372_v10 = vsel %vm352_vm1, %v369_v9, -inf }
  0xa7   : > { %373 = vmax.xlane.f32.xlu0 %v372_v10 }
  0xab   : > { %v370_v11 = vpop.f32.mrf.mxu0 }
  0xbb   : > { %433 = vrot.lane.b32.xlu0 %v432_v8, %s964_s20 }
 0x10a   : > { %v615_v34 = vpop.f32.mrf.mxu0 }
 0x10b   : > { %v1083_v35 = vadd.f32 %v1049_v6, %v615_v34 }
 0x10d   : > { %v619_v36 = vsel %vm352_vm1, %v1083_v35, -inf }
 0x10e   : > { %620 = vmax.xlane.f32.xlu0 %v619_v36 }
 0x112   : > { %v617_v37 = vpop.f32.mrf.mxu0 }
 0x11a   : > { %v374_v16 = vpop.xlane.xlu0 %373 }
 0x11b   : > { %v1061_v17 = vmax.f32 %v1058_v15, %v374_v16 }
 0x11d   : > { %381 = vperm.xlu1 %892, %v1061_v17   ;;  %v376_v58 = vsub.f32 %v1058_v15, %v1061_v17 }
 0x11f   : > { %v377_v61 = vmul.f32 1.442695, %v376_v58 }
 0x125   : > { %428 = vrot.lane.b32.xlu1 %v427_v13, %s964_s20 }
 0x12d   : > { %515 = vrot.lane.b32.xlu1 %v427_v13, %s962_s18  ;;  %v434_v18 = vpop.permute.xlu0 %433 }
 0x12e   : > { %v439_v19 = vsel %vm352_vm1, %v434_v18, 0 }
 0x12f   : > { %448 = vmatpush.bf16.xpose.msra.mxu2 %v439_v19 }
 0x181   : > { %v621_v55 = vpop.xlane.xlu0 %620 }
 0x182   : > { %v1101_v56 = vmax.f32 %v1058_v15, %v621_v55 }
 0x18f   : > { %v1076_v27 = vpop.permute.xlu1 %381 }
 0x190   : > { %v384_v28 = vsub.f32 %v369_v9, %v1076_v27 }
 0x192   : > { %v385_v29 = vmul.f32 1.442695, %v384_v28 }
 0x194   : > { %903 = vpow2.f32 %v385_v29 }
 0x195   : > { %905 = vpow2.f32 %v377_v61 }
 0x197   : > { %v429_v30 = vpop.permute.xlu1 %428 }
 0x198   : > { %847 = vmatmul.msk.bf16.vlgmr.msra.gmra.mxu2 %vm352_vm1, %v429_v30 }
 0x19a   : > { %v904_v31 = vpop.eup %903 }
 0x19b   : > { %v392_v32 = vpack.c.bf16 %v904_v31, %v904_v31  ;;  %v388_v50 = vsel %vm352_vm1, %v904_v31, 0.0  ;;  %v906_v62 = vpop.eup %905 }
 0x19c   : > { %v387_v4 = vmul.f32 %v906_v62, %v1111_v1 }
 0x19d   : > { %846 = vmatmul.msk.bf16.vlgmr.msra.gmra.mxu1 %vm352_vm1, %v392_v32 }
 0x19f   : > { %v516_v33 = vpop.permute.xlu1 %515 }
 0x1ad   : > { %849 = vmatmul.msk.bf16.vlgmr.msrb.gmra.mxu1 %vm352_vm1, %v516_v33 }
 0x21a   : > { %v1087_v38 = vpop.f32.mrf.mxu1 }
 0x21b   : > { %v450_v39 = vpop.f32.mrf.mxu2 }
 0x21c   : > { %v451_v40 = vadd.f32 %v1049_v6, %v450_v39 }
 0x21e   : > { %v454_v41 = vsel %vm352_vm1, %v451_v40, -inf }
 0x21f   : > { %455 = vmax.xlane.f32.xlu1 %v454_v41 }
 0x222   : > { %v411_v42 = vpop.f32.mrf.mxu1 }
 0x223   : > { %v452_v43 = vpop.f32.mrf.mxu2 }
 0x22a   : > { %v534_v44 = vpop.f32.mrf.mxu1 }
 0x22b   : > { %v1092_v45 = vadd.f32 %v1049_v6, %v534_v44 }
 0x22d   : > { %v538_v46 = vsel %vm352_vm1, %v1092_v45, -inf }
 0x22e   : > { %539 = vmax.xlane.f32.xlu2 %v538_v46 }
 0x232   : > { %v536_v48 = vpop.f32.mrf.mxu1 }
 0x238   : > { %478 = vrot.lane.b32.xlu1 %v477_v49, %s964_s20 }
 0x240   : > { %559 = vrot.lane.b32.xlu1 %v477_v49, %s962_s18 }
 0x26a   : > { %389 = vadd.xlane.f32.xlu1 %v388_v50 }
 0x292   : > { %v456_v53 = vpop.xlane.xlu1 %455 }
 0x293   : > { %v457_v54 = vmax.f32 %v1058_v15, %v456_v53 }
 0x295   : > { %463 = vperm.xlu2 %893, %v457_v54   ;;  %v458_v3 = vsub.f32 %v1058_v15, %v457_v54 }
 0x297   : > { %v459_v6 = vmul.f32 1.442695, %v458_v3 }
 0x299   : > { %907 = vpow2.f32 %v459_v6 }
 0x29d   : > { %895 = vset.pattern.permute.xlu2 %v968_v57 }
 0x29e   : > { %628 = vperm.xlu2 %895, %v1101_v56  }
 0x29f   : > { %v908_v8 = vpop.eup %907 }
 0x2a0   : > { %v469_v37 = vmul.f32 %v908_v8, %v1111_v1 }
 0x2a1   : > { %v540_v59 = vpop.xlane.xlu2 %539 }
 0x2a2   : > { %v541_v60 = vmax.f32 %v1058_v15, %v540_v59 }
 0x2a4   : > { %547 = vperm.xlu0 %894, %v541_v60   ;;  %v542_v24 = vsub.f32 %v1058_v15, %v541_v60 }
 0x2a6   : > { %640 = vrot.lane.b32.xlu2 %v477_v49, %s963_s19  ;;  %v543_v25 = vmul.f32 1.442695, %v542_v24 }
 0x2a7   : > { %896 = vset.pattern.permute.xlu2 %v965_v14 }
 0x2aa   : > { %v479_v63 = vpop.permute.xlu1 %478 }
 0x2ab   : > { %v484_v2 = vsel %vm396_vm2, %v479_v63, 0 }
 0x2ac   : > { %897 = vset.pattern.permute.xlu0 %v965_v14  ;;  %493 = vmatpush.bf16.msra.mxu3 %v484_v2 }
 0x2ae   : > { %415 = vperm.xlu2 %896, %v906_v62  }
 0x2b2   : > { %v560_v0 = vpop.permute.xlu1 %559 }
 0x2b3   : > { %v565_v19 = vsel %vm396_vm2, %v560_v0, 0  ;;  %v351_v0 = vld [vmem:[#allocation4] sm:$0xff] }
 0x2b4   : > { %574 = vmatpush.bf16.msrb.mxu3 %v565_v19 }
 0x2b6   : > { %899 = vset.pattern.permute.xlu2 %v967_v52 }
 0x2dd   : > { %v390_v5 = vpop.xlane.xlu1 %389 }
 0x2de   : > { %v391_v7 = vadd.f32 %v390_v5, %v387_v4 }
 0x2e0   : > { %422 = vperm.xlu0 %897, %v391_v7  }
 0x2e8   : > { %898 = vset.pattern.permute.xlu0 %v966_v51 }
 0x2e9   : > { %501 = vperm.xlu0 %898, %v908_v8  }
 0x2ef   : > { %v464_v9 = vpop.permute.xlu2 %463 }
 0x2f0   : > { %v466_v10 = vsub.f32 %v451_v40, %v464_v9  ;;  %v677_v28 = vsel %vm352_vm1, %v1076_v27, %v464_v9 }
 0x2f2   : > { %v467_v11 = vmul.f32 1.442695, %v466_v10 }
 0x2f4   : > { %909 = vpow2.f32 %v467_v11 }
 0x2f8   : > { %v629_v12 = vpop.permute.xlu2 %628 }
 0x2f9   : > { %v631_v13 = vsub.f32 %v1083_v35, %v629_v12 }
 0x2fa   : > { %v910_v14 = vpop.eup %909 }
 0x2fb   : > { %v632_v16 = vmul.f32 1.442695, %v631_v13  ;;  %v470_v17 = vsel %vm352_vm1, %v910_v14, 0.0  ;;  %v474_v18 = vpack.c.bf16 %v910_v14, %v910_v14 }
 0x2fc   : > { %471 = vadd.xlane.f32.xlu2 %v470_v17 }
 0x2fd   : > { %911 = vpow2.f32 %v632_v16  ;;  %848 = vmatmul.msk.bf16.vlgmr.msra.gmra.mxu3 %vm352_vm1, %v474_v18 }
 0x2fe   : > { %913 = vpow2.f32 %v543_v25 }
 0x300   : > { %v641_v20 = vpop.permute.xlu2 %640 }
 0x301   : > { %v646_v21 = vsel %vm396_vm2, %v641_v20, 0 }
 0x302   : > { %655 = vmatpush.bf16.msrb.mxu2 %v646_v21 }
 0x303   : > { %v912_v22 = vpop.eup %911 }
 0x304   : > { %v639_v23 = vpack.c.bf16 %v912_v22, %v912_v22  ;;  %v914_v26 = vpop.eup %913  ;;  %v635_v48 = vsel %vm352_vm1, %v912_v22, 0.0 }
 0x305   : > { %v553_v54 = vmul.f32 %v914_v26, %v1111_v1 }
 0x306   : > { %852 = vmatmul.msk.bf16.vlgmr.msrb.gmra.mxu2 %vm352_vm1, %v639_v23 }
 0x308   : > { %v416_v36 = vpop.permute.xlu2 %415 }
 0x309   : > { %v418_v3 = vmul.f32 %v416_v36, %v351_v0 }
 0x30b   : > { %v419_v8 = vadd.f32 %v418_v3, %v1087_v38 }
 0x314   : > { %582 = vperm.xlu2 %899, %v914_v26  }
 0x316   : > { %v548_v29 = vpop.permute.xlu0 %547 }
 0x317   : > { %v550_v30 = vsub.f32 %v1092_v45, %v548_v29  ;;  %v679_v31 = vsel %vm678_vm3, %v677_v28, %v548_v29  ;;  %v623_v45 = vsub.f32 %v1058_v15, %v1101_v56 }
 0x318   : > { %v681_v32 = vsel %vm680_vm4, %v679_v31, %v629_v12 }
 0x319   : > { %v551_v33 = vmul.f32 1.442695, %v550_v30  ;;  %683 = vst.msk [vmem:[#allocation2] sm:$0xff] %vm326_vm0, %v681_v32  ;;  %v624_v46 = vmul.f32 1.442695, %v623_v45 }
 0x31b   : > { %915 = vpow2.f32 %v551_v33 }
 0x31c   : > { %917 = vpow2.f32 %v624_v46 }
 0x321   : > { %v916_v34 = vpop.eup %915 }
 0x322   : > { %v558_v35 = vpack.c.bf16 %v916_v34, %v916_v34  ;;  %v554_v44 = vsel %vm352_vm1, %v916_v34, 0.0  ;;  %v918_v49 = vpop.eup %917 }
 0x323   : > { %v634_v15 = vmul.f32 %v918_v49, %v1111_v1 }
 0x324   : > { %850 = vmatmul.msk.bf16.vlgmr.msrb.gmra.mxu3 %vm352_vm1, %v558_v35 }
 0x352   : > { %v423_v51 = vpop.permute.xlu0 %422 }
 0x35b   : > { %v502_v52 = vpop.permute.xlu0 %501 }
 0x35c   : > { %v504_v4 = vmul.f32 %v502_v52, %v351_v0 }
 0x36f   : > { %v472_v39 = vpop.xlane.xlu2 %471 }
 0x370   : > { %v473_v27 = vadd.f32 %v472_v39, %v469_v37 }
 0x372   : > { %512 = vperm.xlu0 %898, %v473_v27  }
 0x377   : > { %v583_v61 = vpop.permute.xlu2 %582 }
 0x378   : > { %v585_v7 = vmul.f32 %v583_v61, %v351_v0 }
 0x37a   : > { %900 = vset.pattern.permute.xlu0 %v968_v57 }
 0x380   : > { %v495_v40 = vpop.f32.mrf.mxu3 }
 0x381   : > { %506 = vrot.lane.b32.xlu1 %v495_v40, %s969_s25 }
 0x388   : > { %v497_v41 = vpop.f32.mrf.mxu3 }
 0x389   : > { %v657_v42 = vpop.f32.mrf.mxu2 }
 0x38a   : > { %668 = vrot.lane.b32.xlu2 %v657_v42, %s970_s26 }
 0x391   : > { %v659_v43 = vpop.f32.mrf.mxu2 }
 0x39c   : > { %555 = vadd.xlane.f32.xlu0 %v554_v44 }
 0x3a7   : > { %v576_v47 = vpop.f32.mrf.mxu3 }
 0x3ab   : > { %636 = vadd.xlane.f32.xlu1 %v635_v48 }
 0x3af   : > { %v578_v50 = vpop.f32.mrf.mxu3 }
 0x3b0   : > { %663 = vperm.xlu0 %900, %v918_v49  }
 0x3e4   : > { %v513_v53 = vpop.permute.xlu0 %512  ;;  %v669_v62 = vpop.permute.xlu2 %668 }
 0x3e5   : > { %v684_v13 = vsel %vm352_vm1, %v423_v51, %v513_v53 }
 0x3f3   : > { %v507_v59 = vpop.permute.xlu1 %506 }
 0x3f4   : > { %v509_v5 = vadd.f32 %v507_v59, %v504_v4 }
 0x40f   : > { %v556_v55 = vpop.xlane.xlu0 %555 }
 0x410   : > { %v557_v58 = vadd.f32 %v556_v55, %v553_v54 }
 0x412   : > { %593 = vperm.xlu2 %899, %v557_v58  }
 0x41a   : > { %587 = vrot.lane.b32.xlu2 %v576_v47, %s971_s28 }
 0x41b   : > { %901 = vset.pattern.permute.xlu2 %v968_v57  ;;  %v688_v57 = vsel %vm352_vm1, %v419_v8, %v509_v5 }
 0x41e   : > { %v637_v56 = vpop.xlane.xlu1 %636 }
 0x41f   : > { %v638_v60 = vadd.f32 %v637_v56, %v634_v15 }
 0x422   : > { %674 = vperm.xlu2 %901, %v638_v60   ;;  %v664_v2 = vpop.permute.xlu0 %663 }
 0x423   : > { %v666_v6 = vmul.f32 %v664_v2, %v351_v0 }
 0x425   : > { %v671_v1 = vadd.f32 %v669_v62, %v666_v6 }
 0x46c   : > { %v594_v63 = vpop.permute.xlu2 %593 }
 0x46d   : > { %v685_v14 = vsel %vm678_vm3, %v684_v13, %v594_v63 }
 0x474   : > { %v588_v9 = vpop.permute.xlu2 %587 }
 0x475   : > { %v590_v10 = vadd.f32 %v588_v9, %v585_v7 }
 0x477   : > { %v689_v11 = vsel %vm678_vm3, %v688_v57, %v590_v10 }
 0x478   : > { %v690_v12 = vsel %vm680_vm4, %v689_v11, %v671_v1 }
 0x479   : > { %691 = vst.msk [vmem:[#allocation4] sm:$0xff] %vm326_vm0, %v690_v12 }
 0x47c   : > { %v675_v16 = vpop.permute.xlu2 %674 }
 0x47d   : > { %v686_v17 = vsel %vm680_vm4, %v685_v14, %v675_v16 }
 0x47e   : > { %687 = vst.msk [vmem:[#allocation3] sm:$0xff] %vm326_vm0, %v686_v17 }
 0x47f PF: > { %vm713_vm9 = vcmask 257024  }
 0x480   : > { %v695_v26 = vld [vmem:[#allocation4] sm:$0xff] }
 0x485   : > { %v696_v38 = vld [vmem:[#allocation3] sm:$0xff] }
 0x486   : > { %919 = vrcp.f32 %v696_v38  ;;  %v708_v20 = vand.u32 2147483648, %v696_v38  ;;  %vm702_vm5 = vweird.f32 %v696_v38  ;;  %v706_v22 = vand.u32 2147483647, %v696_v38 }
 0x488   : > { %v709_v24 = vor.u32 1.1754944e-38, %v708_v20  ;;  %vm707_vm8 = vcmp.eq.f32.partialorder %v706_v22, 8.507059e+37 }
 0x48c   : > { %v920_v18 = vpop.eup %919 }
 0x48d   : > { %v698_v19 = vmul.f32 %v920_v18, %v696_v38  ;;  %vm703_vm6 = vweird.f32 %v920_v18 }
 0x48e   : > { %vm704_vm7 = vmor %vm702_vm5, %vm703_vm6 }
 0x48f   : > { %v699_v21 = vsub.f32 1.0, %v698_v19 }
 0x491   : > { %v700_v23 = vmul.f32 %v920_v18, %v699_v21 }
 0x493   : > { %v701_v25 = vadd.f32 %v920_v18, %v700_v23 }
 0x495   : > { %v705_v28 = vsel %vm704_vm7, %v920_v18, %v701_v25 }
 0x496   : > { %v710_v29 = vsel %vm707_vm8, %v709_v24, %v705_v28 }
 0x497   : > { %v711_v30 = vmul.f32 %v710_v29, %v695_v26 }
 0x499   : > { %v712_v31 = vpack.c.bf16 %v711_v30, %v711_v30 }
 0x49b   : > { %714 = vst.msk [vmem:[%s320_s17] sm:$0xf] %vm713_vm9, %v712_v31 }
 0x49c PF: > { %s23_s24 = sadd.s32 1, %s957_s24   ;;  %s1168_s22 = smov %s953_s23 }
 0x49d   : > { %p20_p6 = scmp.ge.s32.totalorder %s23_s24, 4   ;;  %s1169_s23 = smov %s1171_s0 }
 0x49f   :  { %22 = sbr.rel (!%p20_p6) target bundleno = 8 (0x8), region = 87 }

// kernel: protein_bigbird_attention_forward.8
= control target key start
LH: loop header
LB: loop body
LE: loop exit
PB: predicated region body
PF: predicated region fallthrough
CT: control target
= control target key end

     0   :  { %vm69_vm0 = vcmask 261120   ;;  %v455_v15 = vmov 32.0   ;;  %vm355_vm12 = vcmask 257024   ;;  %s610_s2 = inlined_call_operand.vmem [shape: bf16[32,32], index: 2, kind: input, shape index: {}]   ;;  %s611_s3 = inlined_call_operand.vmem [shape: f32[1,32], index: 3, kind: input, shape index: {}]   ;;  %s612_s0 = inlined_call_operand.vmem [shape: bf16[16,32], index: 0, kind: input, shape index: {}]   ;;  %s613_s1 = inlined_call_operand.vmem [shape: bf16[16,32], index: 1, kind: input, shape index: {}]   ;;  %s614_s4 = inlined_call_operand.vmem [shape: f32[1,32], index: 4, kind: input, shape index: {}]   ;;  %s615_s5 = inlined_call_operand.vmem [shape: f32[1,32], index: 5, kind: input, shape index: {}]   ;;  %s616_s7 = inlined_call_operand.vmem [shape: f32[1,128], index: 7, kind: input, shape index: {}]   ;;  %s617_s6 = inlined_call_operand.vmem [shape: bf16[32,128], index: 6, kind: input, shape index: {}]   ;;  %s618_s9 = inlined_call_operand.vmem [shape: f32[1,32], index: 9, kind: input, shape index: {}]   ;;  %s619_s8 = inlined_call_operand.vmem [shape: bf16[128,32], index: 8, kind: input, shape index: {}]   ;;  %s620_s10 = inlined_call_operand.vmem [shape: f32[1,32], index: 10, kind: input, shape index: {}]   ;;  %s621_s11 = inlined_call_operand.vmem [shape: f32[1,32], index: 11, kind: input, shape index: {}]   ;;  %s622_s12 = inlined_call_operand.vmem [shape: bf16[16,32], index: 12, kind: output, shape index: {}]  }
   0x1   :  { %v418_v0 = vld [vmem:[%s610_s2 + $0x8] sm:$0xff]  ;;  %v417_v1 = vld [vmem:[%s610_s2] sm:$0xff]  ;;  %441 = vrcp.f32 %v455_v15  ;;  %v428_v63 = vld [vmem:[%s619_s8 + $0x38] sm:$0xff] }
   0x2   :  { %79 = vmatpush.bf16.msra.mxu0 %v418_v0  ;;  %v416_v2 = vld [vmem:[%s612_s0] sm:$0xff]  ;;  %v420_v32 = vld [vmem:[%s617_s6 + $0x8] sm:$0xff]  ;;  %281 = vmatpush.bf16.msra.mxu2 %v428_v63  ;;  %v427_v0 = vld [vmem:[%s619_s8 + $0x30] sm:$0xff] }
   0x3   :  { %v430_v3 = vld [vmem:[%s613_s1] sm:$0xff]   ;;  %186 = vmatpush.bf16.msra.mxu1 %v420_v32 }
   0x4   :  { %v434_v4 = vld [vmem:[%s611_s3] ss:$0 sm:$0xff]  ;;  %v431_v5 = vunpack.c.l.bf16 %v430_v3  ;;  %v432_v10 = vunpack.c.h.bf16 %v430_v3  ;;  %v424_v3 = vld [vmem:[%s619_s8 + $0x18] sm:$0xff] }
   0x5   :  { %v419_v34 = vld [vmem:[%s617_s6] sm:$0xff] }
   0x6   :  { %80 = vmatpush.bf16.msra.mxu0 %v417_v1  ;;  %v435_v53 = vld [vmem:[%s614_s4] ss:$0 sm:$0xff]  ;;  %282 = vmatpush.bf16.msra.mxu2 %v427_v0  ;;  %v426_v1 = vld [vmem:[%s619_s8 + $0x28] sm:$0xff] }
   0x7   :  { %v442_v16 = vpop.eup %441  ;;  %187 = vmatpush.bf16.msra.mxu1 %v419_v34  ;;  %v436_v58 = vld [vmem:[%s615_s5] ss:$0 sm:$0xff] }
   0x8   :  { %v102_v17 = vmul.f32 32.0, %v442_v16  ;;  %vm106_vm1 = vweird.f32 %v442_v16  ;;  %v438_v32 = vld [vmem:[%s618_s9] ss:$0 sm:$0xff] }
   0x9   :  { %374 = vmatmul.msk.bf16.vlgmr.msra.gmra.mxu0 %vm69_vm0, %v416_v2  ;;  %v425_v2 = vld [vmem:[%s619_s8 + $0x20] sm:$0xff] }
   0xa   :  { %v103_v18 = vsub.f32 1.0, %v102_v17  ;;  %283 = vmatpush.bf16.msra.mxu2 %v426_v1  ;;  %v439_v1 = vld [vmem:[%s620_s10] ss:$0 sm:$0xff] }
   0xc   :  { %v104_v19 = vmul.f32 %v442_v16, %v103_v18 }
   0xe   :  { %v105_v20 = vadd.f32 %v442_v16, %v104_v19  ;;  %284 = vmatpush.bf16.msra.mxu2 %v425_v2 }
  0x10   :  { %v539_v21 = vsel %vm106_vm1, %v442_v16, %v105_v20 }
  0x12   :  { %285 = vmatpush.bf16.msra.mxu2 %v424_v3 }
  0x86   :  { %v82_v6 = vpop.f32.mrf.mxu0 }
  0x87   :  { %v83_v7 = vadd.f32 %v434_v4, %v82_v6  ;;  %v437_v6 = vld [vmem:[%s616_s7] ss:$0 sm:$0xff] }
  0x89   :  { %v91_v8 = vadd.f32 %v431_v5, %v83_v7  ;;  %v422_v5 = vld [vmem:[%s619_s8 + $0x8] sm:$0xff]  ;;  %v421_v7 = vld [vmem:[%s619_s8] sm:$0xff] }
  0x8b   :  { %v95_v9 = vsel %vm69_vm0, %v91_v8, 0.0 }
  0x8c   :  { %96 = vadd.xlane.f32.xlu0 %v95_v9 }
  0x8e   :  { %v84_v11 = vpop.f32.mrf.mxu0 }
  0x8f   :  { %v85_v12 = vadd.f32 %v434_v4, %v84_v11  ;;  %v423_v4 = vld [vmem:[%s619_s8 + $0x10] sm:$0xff] }
  0x90   :  { %286 = vmatpush.bf16.msra.mxu2 %v423_v4 }
  0x91   :  { %v92_v13 = vadd.f32 %v432_v10, %v85_v12 }
  0x93   :  { %v98_v14 = vsel %vm69_vm0, %v92_v13, 0.0 }
  0x94   :  { %99 = vadd.xlane.f32.xlu0 %v98_v14  ;;  %287 = vmatpush.bf16.msra.mxu2 %v422_v5 }
  0x98   :  { %288 = vmatpush.bf16.msra.mxu2 %v421_v7 }
  0xff   :  { %v97_v22 = vpop.xlane.xlu0 %96 }
 0x100   :  { %v108_v23 = vmul.f32 %v539_v21, %v97_v22 }
 0x102   :  { %v110_v24 = vsub.f32 %v91_v8, %v108_v23 }
 0x104   :  { %v112_v25 = vmul.f32 %v110_v24, %v110_v24 }
 0x106   :  { %v114_v26 = vsel %vm69_vm0, %v112_v25, 0.0 }
 0x107   :  { %115 = vadd.xlane.f32.xlu1 %v114_v26  ;;  %v100_v27 = vpop.xlane.xlu0 %99 }
 0x108   :  { %v109_v28 = vmul.f32 %v539_v21, %v100_v27 }
 0x10a   :  { %v111_v29 = vsub.f32 %v92_v13, %v109_v28 }
 0x10c   :  { %v113_v30 = vmul.f32 %v111_v29, %v111_v29 }
 0x10e   :  { %v117_v31 = vsel %vm69_vm0, %v113_v30, 0.0 }
 0x10f   :  { %118 = vadd.xlane.f32.xlu1 %v117_v31 }
 0x17a   :  { %v116_v33 = vpop.xlane.xlu1 %115 }
 0x17b   :  { %v120_v35 = vmul.f32 %v116_v33, %v539_v21 }
 0x17d   :  { %v122_v36 = vadd.f32 1e-12, %v120_v35 }
 0x17f   :  { %443 = vrsqrt.f32 %v122_v36  ;;  %vm130_vm3 = vweird.f32 %v122_v36 }
 0x182   :  { %v119_v37 = vpop.xlane.xlu1 %118 }
 0x183   :  { %v121_v38 = vmul.f32 %v119_v37, %v539_v21 }
 0x185   :  { %v444_v39 = vpop.eup %443  ;;  %v123_v40 = vadd.f32 1e-12, %v121_v38 }
 0x186   :  { %v125_v41 = vmul.f32 %v444_v39, %v122_v36  ;;  %vm131_vm2 = vweird.f32 %v444_v39 }
 0x187   :  { %445 = vrsqrt.f32 %v123_v40  ;;  %vm132_vm4 = vmor %vm130_vm3, %vm131_vm2  ;;  %vm140_vm6 = vweird.f32 %v123_v40 }
 0x188   :  { %v126_v42 = vmul.f32 %v444_v39, %v125_v41 }
 0x18a   :  { %v127_v43 = vmul.f32 0.5, %v126_v42 }
 0x18c   :  { %v128_v44 = vsub.f32 1.5, %v127_v43 }
 0x18d   :  { %v446_v45 = vpop.eup %445 }
 0x18e   :  { %v129_v46 = vmul.f32 %v444_v39, %v128_v44  ;;  %v135_v47 = vmul.f32 %v446_v45, %v123_v40  ;;  %vm141_vm5 = vweird.f32 %v446_v45 }
 0x18f   :  { %vm142_vm7 = vmor %vm140_vm6, %vm141_vm5 }
 0x190   :  { %v136_v48 = vmul.f32 %v446_v45, %v135_v47  ;;  %v133_v49 = vsel %vm132_vm4, %v444_v39, %v129_v46 }
 0x191   :  { %v144_v52 = vmul.f32 %v133_v49, %v110_v24 }
 0x192   :  { %v137_v50 = vmul.f32 0.5, %v136_v48 }
 0x193   :  { %v149_v57 = vmul.f32 %v435_v53, %v144_v52 }
 0x194   :  { %v138_v51 = vsub.f32 1.5, %v137_v50 }
 0x195   :  { %v154_v60 = vadd.f32 %v436_v58, %v149_v57 }
 0x196   :  { %v139_v54 = vmul.f32 %v446_v45, %v138_v51 }
 0x198   :  { %v143_v55 = vsel %vm142_vm7, %v446_v45, %v139_v54 }
 0x199   :  { %v145_v56 = vmul.f32 %v143_v55, %v111_v29 }
 0x19b   :  { %v150_v59 = vmul.f32 %v435_v53, %v145_v56 }
 0x19d   :  { %v155_v61 = vadd.f32 %v436_v58, %v150_v59 }
 0x19f   :  { %v156_v62 = vpack.c.bf16 %v155_v61, %v154_v60 }
 0x1a1   :  { %383 = vmatmul.msk.bf16.vlgmr.msra.gmra.mxu1 %vm69_vm0, %v156_v62 }
 0x21e   :  { %v189_v8 = vpop.f32.mrf.mxu1 }
 0x21f   :  { %v190_v9 = vadd.f32 %v437_v6, %v189_v8 }
 0x221   :  { %v194_v10 = vmul.f32 %v190_v9, %v190_v9 }
 0x223   :  { %v196_v11 = vmul.f32 %v194_v10, %v190_v9 }
 0x225   :  { %v198_v12 = vmul.f32 0.044715, %v196_v11 }
 0x226   :  { %v191_v13 = vpop.f32.mrf.mxu1 }
 0x227   :  { %v200_v14 = vadd.f32 %v198_v12, %v190_v9  ;;  %v192_v15 = vadd.f32 %v437_v6, %v191_v13 }
 0x229   :  { %v195_v16 = vmul.f32 %v192_v15, %v192_v15  ;;  %v202_v17 = vmul.f32 0.7978846, %v200_v14 }
 0x22b   :  { %v197_v18 = vmul.f32 %v195_v16, %v192_v15  ;;  %447 = vtanh.f32 %v202_v17 }
 0x22d   :  { %v199_v19 = vmul.f32 0.044715, %v197_v18 }
 0x22f   :  { %v201_v20 = vadd.f32 %v199_v19, %v192_v15 }
 0x231   :  { %v203_v22 = vmul.f32 0.7978846, %v201_v20  ;;  %v448_v23 = vpop.eup %447 }
 0x232   :  { %v206_v24 = vadd.f32 1.0, %v448_v23 }
 0x233   :  { %449 = vtanh.f32 %v203_v22 }
 0x234   :  { %v208_v27 = vmul.f32 0.5, %v206_v24 }
 0x236   :  { %v210_v29 = vmul.f32 %v208_v27, %v190_v9 }
 0x239   :  { %v450_v25 = vpop.eup %449 }
 0x23a   :  { %v207_v26 = vadd.f32 1.0, %v450_v25 }
 0x23c   :  { %v209_v28 = vmul.f32 0.5, %v207_v26 }
 0x23e   :  { %v211_v30 = vmul.f32 %v209_v28, %v192_v15 }
 0x240   :  { %v212_v31 = vpack.c.bf16 %v211_v30, %v210_v29 }
 0x242   :  { %289 = vmatmul.bf16.vlgmr.msra.gmra.mxu2 %v212_v31 }
 0x2c5   :  { %v290_v33 = vpop.f32.mrf.mxu2 }
 0x2c6   :  { %v291_v34 = vadd.f32 %v438_v32, %v290_v33 }
 0x2c8   :  { %v295_v35 = vadd.f32 %v291_v34, %v154_v60 }
 0x2ca   :  { %v299_v36 = vsel %vm69_vm0, %v295_v35, 0.0 }
 0x2cb   :  { %300 = vadd.xlane.f32.xlu2 %v299_v36 }
 0x2cd   :  { %v292_v37 = vpop.f32.mrf.mxu2 }
 0x2ce   :  { %v293_v38 = vadd.f32 %v438_v32, %v292_v37 }
 0x2d0   :  { %v296_v39 = vadd.f32 %v293_v38, %v155_v61 }
 0x2d2   :  { %v302_v40 = vsel %vm69_vm0, %v296_v39, 0.0 }
 0x2d3   :  { %303 = vadd.xlane.f32.xlu2 %v302_v40 }
 0x33e   :  { %v301_v41 = vpop.xlane.xlu2 %300 }
 0x33f   :  { %v305_v42 = vmul.f32 %v301_v41, %v539_v21 }
 0x341   :  { %v307_v43 = vsub.f32 %v295_v35, %v305_v42 }
 0x343   :  { %v309_v44 = vmul.f32 %v307_v43, %v307_v43 }
 0x345   :  { %v311_v45 = vsel %vm69_vm0, %v309_v44, 0.0 }
 0x346   :  { %312 = vadd.xlane.f32.xlu0 %v311_v45  ;;  %v304_v46 = vpop.xlane.xlu2 %303 }
 0x347   :  { %v306_v47 = vmul.f32 %v304_v46, %v539_v21 }
 0x349   :  { %v308_v48 = vsub.f32 %v296_v39, %v306_v47 }
 0x34b   :  { %v310_v49 = vmul.f32 %v308_v48, %v308_v48 }
 0x34d   :  { %v314_v50 = vsel %vm69_vm0, %v310_v49, 0.0 }
 0x34e   :  { %315 = vadd.xlane.f32.xlu1 %v314_v50 }
 0x3b9   :  { %v313_v51 = vpop.xlane.xlu0 %312 }
 0x3ba   :  { %v317_v52 = vmul.f32 %v313_v51, %v539_v21 }
 0x3bc   :  { %v319_v53 = vadd.f32 1e-12, %v317_v52 }
 0x3be   :  { %451 = vrsqrt.f32 %v319_v53  ;;  %vm327_vm9 = vweird.f32 %v319_v53 }
 0x3c1   :  { %v316_v54 = vpop.xlane.xlu1 %315 }
 0x3c2   :  { %v318_v55 = vmul.f32 %v316_v54, %v539_v21  ;;  %v440_v21 = vld [vmem:[%s621_s11] ss:$0 sm:$0xff] }
 0x3c4   :  { %v452_v56 = vpop.eup %451  ;;  %v320_v57 = vadd.f32 1e-12, %v318_v55 }
 0x3c5   :  { %v322_v58 = vmul.f32 %v452_v56, %v319_v53  ;;  %vm328_vm8 = vweird.f32 %v452_v56 }
 0x3c6   :  { %453 = vrsqrt.f32 %v320_v57  ;;  %vm329_vm10 = vmor %vm327_vm9, %vm328_vm8  ;;  %vm337_vm13 = vweird.f32 %v320_v57 }
 0x3c7   :  { %v323_v59 = vmul.f32 %v452_v56, %v322_v58 }
 0x3c9   :  { %v324_v60 = vmul.f32 0.5, %v323_v59 }
 0x3cb   :  { %v325_v61 = vsub.f32 1.5, %v324_v60 }
 0x3cc   :  { %v454_v62 = vpop.eup %453 }
 0x3cd   :  { %v326_v63 = vmul.f32 %v452_v56, %v325_v61  ;;  %v332_v0 = vmul.f32 %v454_v62, %v320_v57  ;;  %vm338_vm11 = vweird.f32 %v454_v62 }
 0x3ce   :  { %vm339_vm14 = vmor %vm337_vm13, %vm338_vm11 }
 0x3cf   :  { %v330_v2 = vsel %vm329_vm10, %v452_v56, %v326_v63  ;;  %v333_v3 = vmul.f32 %v454_v62, %v332_v0 }
 0x3d0   :  { %v341_v4 = vmul.f32 %v330_v2, %v307_v43 }
 0x3d1   :  { %v334_v5 = vmul.f32 0.5, %v333_v3 }
 0x3d2   :  { %v346_v6 = vmul.f32 %v439_v1, %v341_v4 }
 0x3d3   :  { %v335_v7 = vsub.f32 1.5, %v334_v5 }
 0x3d4   :  { %v351_v8 = vadd.f32 %v440_v21, %v346_v6 }
 0x3d5   :  { %v336_v9 = vmul.f32 %v454_v62, %v335_v7 }
 0x3d6   :  { %v353_v10 = vpack.c.bf16 %v351_v8, %v351_v8 }
 0x3d7   :  { %v340_v11 = vsel %vm339_vm14, %v454_v62, %v336_v9 }
 0x3d8   :  { %356 = vst.msk [vmem:[%s622_s12] sm:$0xf] %vm355_vm12, %v353_v10  ;;  %v342_v12 = vmul.f32 %v340_v11, %v308_v48 }
 0x3da   :  { %v347_v13 = vmul.f32 %v439_v1, %v342_v12 }
 0x3dc   :  { %v352_v14 = vadd.f32 %v440_v21, %v347_v13 }
 0x3de   :  { %v354_v15 = vpack.c.bf16 %v352_v14, %v352_v14 }
 0x3e0   :  { %357 = vst.msk [vmem:[%s622_s12 + $0x4] sm:$0xf] %vm355_vm12, %v354_v15 }

// kernel: protein_bigbird_attention_forward.9
= control target key start
LH: loop header
LB: loop body
LE: loop exit
PB: predicated region body
PF: predicated region fallthrough
CT: control target
= control target key end

     0   :  { %s724_s0 = inlined_call_operand.vmem [shape: bf16[2,8,32], index: 0, kind: input, shape index: {}]   ;;  %s725_s1 = inlined_call_operand.vmem [shape: f32[2,1,8], index: 1, kind: input, shape index: {}]   ;;  %s726_s2 = inlined_call_operand.vmem [shape: bf16[1,32], index: 2, kind: input, shape index: {}]   ;;  %s727_s3 = inlined_call_operand.<no memory space> [shape: f32[1,1], index: 3, kind: input, shape index: {}]   ;;  %s728_s4 = inlined_call_operand.vmem [shape: bf16[32,4], index: 4, kind: input, shape index: {}]   ;;  %s729_s5 = inlined_call_operand.vmem [shape: f32[1,4], index: 5, kind: input, shape index: {}]   ;;  %s730_s6 = inlined_call_operand.hbm [shape: f32[2,1,4], index: 6, kind: output, shape index: {}]  }
   0x1   :  { %v11_v0 = vstv %s727_s3 }
   0x2   :  { %12 = vst [vmem:[#allocation2] sm:$0x1] %v11_v0 }
   0x3   :  { %13 = vsyncpa [#allocation4], 0 }
   0x4   :  { %15 = vsyncpa [#allocation4 + $0x1], 0  ;;  %s621_s23 = smov 0   ;;  %s623_s24 = smov 0  }
   0x5   :  { %s625_s25 = smov 0   ;;  %s627_s26 = smov 0  }
   0x6 LB: > { %s642_s3 = sadd.s32 4294967295, %s580_s26   ;;  %s453_s27 = sadd.s32 4294967294, %s580_s26   ;;  %s580_s26 = sphi %s627_s26, %s736_s26   ;;  %s576_s25 = sphi %s625_s25, %s735_s25   ;;  %s572_s24 = sphi %s623_s24, %s734_s24   ;;  %s568_s23 = sphi %s621_s23, %s733_s23  }
   0x7   : > { %s646_s28 = sadd.s32 1, %s580_s26   ;;  %s164_s29 = sadd.s32 1, %s576_s25 }
   0x8   : > { %s161_s30 = ssub.s32 %s580_s26, %s646_s28  ;;  %p174_p0 = scmp.ne.s32.totalorder %s576_s25, %s572_s24 }
   0x9   : > { %p162_p1 = scmp.eq.s32.totalorder %s161_s30, 0  ;;  %p175_p2 = scmp.eq.s32.totalorder %s642_s3, 1 }
   0xa   : > { %p180_p3 = scmp.ne.s32.totalorder %s572_s24, %s568_s23  ;;  %p181_p4 = scmp.eq.s32.totalorder %s453_s27, 1 }
   0xb   : > { %s657_s7 = scalar_select %p162_p1, %s576_s25, %s164_s29  }
   0xc   : > { %p659_p5 = por %p175_p2, %p174_p0  ;;  %p663_p6 = por %p181_p4, %p180_p3 }
   0xd   : > { %p456_p7 = scmp.ge.s32.totalorder %s580_s26, 1  ;;  %p224_p8 = scmp.lt.s32.totalorder %s580_s26, 3 }
   0xf   : > { %p225_p9 = pnand %p456_p7, %p224_p8 }
  0x10   : > { %p255_p10 = scmp.lt.s32.totalorder (!%p225_p9), %s642_s3, 1  ;;  %s253_s29 = sand.u32 (!%p225_p9), 1, %s572_s24  }
  0x11   : > { %228 = sbr.rel (%p225_p9) target bundleno = 699 (0x2bb), region = 44  ;;  %s377_s17 = scalar_lea.sflag (!%p225_p9), [#allocation4], %s253_s29 }
  0x12   : > { %s538_s21 = scalar_lea.hbm (!%p225_p9), %s730_s6, 2 }
  0x16   : > { %v582_v1 = vmov 0   ;;  %v265_v2 = vld [vmem:[#allocation2] sm:$0x1]  ;;  %s256_s10 = scalar_select %p255_p10, %s642_s3, 1  ;;  %vm272_vm0 = vcmask 261120   ;;  %vm294_vm1 = vcmask 57344  }
  0x17   : > { %513 = vset.pattern.permute.xlu0 %v582_v1  ;;  %v264_v5 = vld [vmem:[%s726_s2] sm:$0x1]  ;;  %vm324_vm2 = vcmask 1043456   ;;  %v472_v20 = vld [vmem:[%s728_s4 + $0x8] sm:$0xff]  ;;  %vm320_vm7 = vcmask 64512   ;;  %vm374_vm8 = vcmask 24576  }
  0x18   : > { %268 = vperm.xlu0 %513, %v265_v2   ;;  %s457_s11 = sshll.u32 %s256_s10, 2  ;;  %s261_s19 = scalar_lea.vmem %s725_s1, %s256_s10  ;;  %367 = vmatpush.bf16.msra.mxu2 %v472_v20  ;;  %v471_v34 = vld [vmem:[%s728_s4] sm:$0xff] }
  0x19   : > { %s258_s14 = scalar_lea.vmem %s724_s0, %s457_s11  ;;  %v292_v9 = vld [vmem:[%s261_s19] sm:$0x1]  ;;  %s385_s11 = scalar_lea.hbm %s730_s6, %s642_s3 }
  0x1a   : > { %v263_v3 = vld [vmem:[%s258_s14] sm:$0xf]  ;;  %s254_s14 = scalar_lea.vmem [#allocation3], %s253_s29  ;;  %s389_s16 = sshll.u32 %s385_s11, 4  ;;  %s390_s16 = int_to_ptr.hbm [resolvable:$true] %s389_s16 }
  0x1b   : > { %v277_v4 = vsel %vm272_vm0, %v263_v3, 0  ;;  %v325_v19 = vsel %vm324_vm2, %v263_v3, 0  ;;  %v345_v38 = vld [vmem:[%s729_s5] sm:$0x1]  ;;  %s387_s15 = sshll.u32 %s254_s14, 4  ;;  %s532_s18 = sshra.s32 %s390_s16, 4  ;;  %s388_s15 = int_to_ptr.vmem [resolvable:$true] %s387_s15  ;;  %s533_s18 = int_to_ptr.hbm [resolvable:$true] %s532_s18 }
  0x1c   : > { %286 = vmatpush.bf16.xpose.msra.mxu0 %v277_v4  ;;  %334 = vmatpush.bf16.msra.mxu1 %v325_v19  ;;  %s534_s19 = scalar_lea.hbm %s533_s18, 1  ;;  %p539_p0 = scmp.lt.s32.totalorder %s533_s18, %s730_s6 }
  0x1d   : > { %368 = vmatpush.bf16.msra.mxu2 %v471_v34  ;;  %p535_p11 = scmp.ne.s32.totalorder %s533_s18, %s534_s19  ;;  %p540_p1 = scmp.lt.s32.totalorder %s538_s21, %s534_s19 }
  0x1f   : > { %p536_p12 = pnand %p535_p11, %p659_p5  ;;  %p541_p2 = por %p540_p1, %p539_p0 }
  0x21   : > { %p537_p13 = pneg %p536_p12 }
  0x23   : > { %458 = vmatmul.msk.bf16.vlgmr.msra.gmra.mxu0 %vm272_vm0, %v264_v5  ;;  %p542_p3 = pnand %p541_p2, %p537_p13 }
  0x8a   : > { %v269_v6 = vpop.permute.xlu0 %268 }
  0x8b   : > { %v271_v7 = vperm.slane %v269_v6, 0 }
  0xa0   : > { %v288_v8 = vpop.f32.mrf.mxu0 }
  0xa1   : > { %v289_v10 = vadd.f32 %v288_v8, %v271_v7 }
  0xa3   : > { %v293_v11 = vadd.f32 %v292_v9, %v289_v10 }
  0xa5   : > { %v295_v12 = vsel %vm294_vm1, %v293_v11, -inf }
  0xa6   : > { %296 = vmax.xlane.f32.xlu0 %v295_v12 }
  0xa8   : > { %v290_v13 = vpop.f32.mrf.mxu0 }
 0x119   : > { %v297_v14 = vpop.xlane.xlu0 %296 }
 0x11a   : > { %v298_v15 = vsub.f32 %v293_v11, %v297_v14 }
 0x11c   : > { %v299_v16 = vmul.f32 1.442695, %v298_v15 }
 0x11e   : > { %514 = vpow2.f32 %v299_v16 }
 0x124   : > { %v515_v17 = vpop.eup %514 }
 0x125   : > { %v301_v18 = vsel %vm294_vm1, %v515_v17, 0.0 }
 0x126   : > { %302 = vadd.xlane.f32.xlu1 %v301_v18 }
 0x199   : > { %v303_v21 = vpop.xlane.xlu1 %302 }
 0x19a   : > { %516 = vrcp.f32 %v303_v21  ;;  %v315_v25 = vand.u32 2147483648, %v303_v21  ;;  %v313_v27 = vand.u32 2147483647, %v303_v21  ;;  %vm309_vm4 = vweird.f32 %v303_v21 }
 0x19c   : > { %v316_v29 = vor.u32 1.1754944e-38, %v315_v25  ;;  %vm314_vm6 = vcmp.eq.f32.partialorder %v313_v27, 8.507059e+37 }
 0x1a0   : > { %v517_v22 = vpop.eup %516 }
 0x1a1   : > { %v305_v23 = vmul.f32 %v517_v22, %v303_v21  ;;  %vm310_vm3 = vweird.f32 %v517_v22 }
 0x1a2   : > { %vm311_vm5 = vmor %vm309_vm4, %vm310_vm3 }
 0x1a3   : > { %v306_v24 = vsub.f32 1.0, %v305_v23 }
 0x1a5   : > { %v307_v26 = vmul.f32 %v517_v22, %v306_v24 }
 0x1a7   : > { %v308_v28 = vadd.f32 %v517_v22, %v307_v26 }
 0x1a9   : > { %v312_v30 = vsel %vm311_vm5, %v517_v22, %v308_v28 }
 0x1aa   : > { %v317_v31 = vsel %vm314_vm6, %v316_v29, %v312_v30 }
 0x1ab   : > { %v318_v32 = vmul.f32 %v515_v17, %v317_v31 }
 0x1ad   : > { %v319_v33 = vpack.c.bf16 %v318_v32, %v318_v32 }
 0x1af   : > { %459 = vmatmul.msk.bf16.vlgmr.msra.gmra.mxu1 %vm320_vm7, %v319_v33 }
 0x22c   : > { %v336_v35 = vpop.f32.mrf.mxu1 }
 0x22d   : > { %v340_v36 = vpack.c.bf16 %v336_v35, %v336_v35 }
 0x22f   : > { %468 = vmatmul.msk.bf16.vlgmr.msra.gmra.mxu2 %vm272_vm0, %v340_v36 }
 0x234   : > { %v338_v37 = vpop.f32.mrf.mxu1 }
 0x2b2   : > { %v370_v39 = vpop.f32.mrf.mxu2 }
 0x2b3   : > { %v371_v40 = vadd.f32 %v370_v39, %v345_v38 }
 0x2b5   : > { %375 = vst.msk [vmem:[%s254_s14] sm:$0x1] %vm374_vm8, %v371_v40 }
 0x2b6   : > { %545 = shalt.err (!%p542_p3)
}
 0x2b7   : > { %473 = dma.vmem_to_hbm [thread:$0]  (%p659_p5), %s388_s15, 16, %s390_s16, %s377_s17  }
 0x2ba   : > { %v372_v41 = vpop.f32.mrf.mxu2 }
 0x2bb PF: > { %p479_p4 = scmp.ge.s32.totalorder %s580_s26, 2  ;;  %s401_s29 = sand.u32 1, %s568_s23  }
 0x2bc   : > { %s402_s30 = scalar_lea.sflag [#allocation4], %s401_s29 }
 0x2bd   : > { %p476_p7 = pnand %p479_p4, %p663_p6 }
 0x2bf   : > { %p477_p8 = pneg %p476_p7 }
 0x2c1   : > { %563 = dma.done.wait (%p477_p8), %s402_s30, 16  }
 0x2c2   : > { %565 = vsyncadd (%p477_p8), %s402_s30, 4294967280  ;;  %p18_p9 = scmp.ge.s32.totalorder %s646_s28, 4   ;;  %s733_s23 = smov %s572_s24 }
 0x2c3   : > { %s734_s24 = smov %s576_s25  ;;  %s735_s25 = smov %s657_s7 }
 0x2c4   : > { %s736_s26 = smov %s646_s28  ;;  %20 = sbr.rel (!%p18_p9) target bundleno = 6 (0x6), region = 82 }
 0x2c9   :  { %407 = vsyncpa [#allocation4], 1 }
 0x2ca   :  { %409 = vsyncpa [#allocation4 + $0x1], 1 }

</bundles_post_ra>
